<compile_context>
chip_gen: v7x
topology: tpu7x:2x2x1
jax: 0.10.0
libtpu: 0.0.40
codegen_flags: <defaults>
</compile_context>

<pallas_src>
import functools

import jax
import jax.numpy as jnp
from jax import lax
from jax.experimental import pallas as pl
from jax.experimental.pallas import tpu as pltpu


# ------------------------------------------------------------------- kernel --

def _basic_block_kernel(x_ref, b1_ref, b2_ref, o_ref, xp_ref, *, Nb, H, W, C):
    """Fused conv1(gated) -> conv2(gated) -> +residual -> relu for Nb images.

    x_ref  : (Nb, H, W*C)        bf16 lane-dense NHWC rows.
    b1_ref : (3*W*C, 2*W*C)      bf16 banded conv1 weights (ky folded into K,
                                 feat | gate concatenated along N).
    b2_ref : (3*W*C, 2*W*C)      bf16 banded conv2 weights.
    o_ref  : (Nb, H, W*C)        f32 lane-dense output rows.
    xp_ref : (Nb, H+2, W*C) f32  VMEM scratch = row-halo-padded activation.
    """
    WC = W * C
    x_bf = x_ref[...]                          # (Nb, H, WC) bf16
    x_f32 = x_bf.astype(jnp.float32)           # residual, f32

    # Zero ONLY the two halo rows, once per kernel invocation: rows 1..H are
    # fully overwritten by every conv and the halo rows are never written.
    zrow = jnp.zeros((Nb, 1, WC), xp_ref.dtype)
    xp_ref[:, 0:1, :] = zrow
    xp_ref[:, H + 1:H + 2, :] = zrow

    def gated_conv(b_ref, inp_f32):
        # inp_f32: (Nb, H, WC) f32 activation for this conv.
        xp_ref[:, 1:H + 1, :] = inp_f32
        # Fold the 3 vertical taps into K: LHS is (Nb*H, 3*WC); width-wise zero
        # padding is implicit in the banded weights.  ONE bf16 MXU matmul with
        # f32 accumulation covers feat and gate for all Nb images.
        lhs = jnp.concatenate(
            [xp_ref[:, ky:ky + H, :] for ky in range(3)], axis=-1
        ).reshape(Nb * H, 3 * WC)
        acc = jnp.dot(lhs.astype(jnp.bfloat16), b_ref[...],
                      preferred_element_type=jnp.float32)     # (Nb*H, 2*WC) f32
        feat, gate = acc[:, :WC], acc[:, WC:]
        return (feat * jax.nn.sigmoid(gate)).reshape(Nb, H, WC)   # f32

    out1 = gated_conv(b1_ref, x_f32)            # conv1, stays in VMEM
    out2 = gated_conv(b2_ref, out1)             # conv2
    o_ref[...] = jnp.maximum(out2 + x_f32, 0.0).astype(o_ref.dtype)


# ------------------------------------------------------------------ wrapper --

def _banded_weights(wf, wg, W):
    """Fold ky, kx taps and the feat/gate pair into one banded matrix.

    wf, wg: [9, Cin, Cout] with tap = ky*3 + kx.
    Returns (3*W*Cin, 2*W*Cout) bf16 with the ky tap blocks stacked along K
    (matching the kernel's LHS concatenation) and feat | gate along N:
      B[ky*W*Cin + (wo+kx-1)*Cin + ci, wo*Cout + co]          = wf[ky*3+kx, ci, co]
      B[ky*W*Cin + (wo+kx-1)*Cin + ci, W*Cout + wo*Cout + co] = wg[ky*3+kx, ci, co]
    for 0 <= wo + kx - 1 < W (out-of-range taps dropped == zero padding).
    """
    mats = []
    for ky in range(3):
        bf = sum(jnp.kron(jnp.eye(W, W, k=1 - kx, dtype=jnp.float32),
                          wf[ky * 3 + kx].astype(jnp.float32)) for kx in range(3))
        bg = sum(jnp.kron(jnp.eye(W, W, k=1 - kx, dtype=jnp.float32),
                          wg[ky * 3 + kx].astype(jnp.float32)) for kx in range(3))
        mats.append(jnp.concatenate([bf, bg], axis=1))
    return jnp.concatenate(mats, axis=0).astype(jnp.bfloat16)


def basic_block_forward(x_nchw, params, *, nb=8):
    """BasicBlock.forward: conv1(gated) -> conv2(gated) -> +residual -> relu."""
    N, C, H, W = x_nchw.shape
    WC = W * C
    assert WC % 128 == 0, "lane-dense layout needs W*C to be a multiple of 128"
    assert N % nb == 0, "demo assumes the batch divides the per-step image tile"

    # One-time relayout + bf16 cast (see layout TODO at top of file).
    x_rows = (jnp.transpose(x_nchw, (0, 2, 3, 1))
              .reshape(N, H, WC).astype(jnp.bfloat16))
    b1 = _banded_weights(params["w1f"], params["w1g"], W)
    b2 = _banded_weights(params["w2f"], params["w2g"], W)

    kernel = functools.partial(_basic_block_kernel, Nb=nb, H=H, W=W, C=C)
    out_rows = pl.pallas_call(
        kernel,
        out_shape=jax.ShapeDtypeStruct((N, H, WC), jnp.float32),
        grid_spec=pltpu.PrefetchScalarGridSpec(
            num_scalar_prefetch=0,
            grid=(N // nb,),                         # Nb images per grid step
            in_specs=[
                pl.BlockSpec((nb, H, WC), lambda n: (n, 0, 0)),
                # Grid-invariant weights: single-buffered, resident in VMEM.
                pl.BlockSpec(b1.shape, lambda n: (0, 0),
                             pipeline_mode=pl.Buffered(1)),
                pl.BlockSpec(b2.shape, lambda n: (0, 0),
                             pipeline_mode=pl.Buffered(1)),
            ],
            out_specs=pl.BlockSpec((nb, H, WC), lambda n: (n, 0, 0)),
            scratch_shapes=[pltpu.VMEM((nb, H + 2, WC), jnp.float32)],
        ),
        compiler_params=pltpu.CompilerParams(
            dimension_semantics=("parallel",),       # megacore sharding on v7x
            vmem_limit_bytes=32 * 1024 * 1024,       # explicit budget (v7x-safe)
        ),
    )(x_rows, b1, b2)
    return jnp.transpose(out_rows.reshape(N, H, W, C), (0, 3, 1, 2))


# ---------------------------------------------------------------- reference --

def _ref_gated_conv(x_nhwc, wf, wg):
    Cin, Cout = wf.shape[1], wf.shape[2]
    dn = lax.conv_dimension_numbers(x_nhwc.shape, (3, 3, Cin, Cout),
                                    ("NHWC", "HWIO", "NHWC"))
    f = lax.conv_general_dilated(x_nhwc, wf.reshape(3, 3, Cin, Cout), (1, 1),
                                 "SAME", dimension_numbers=dn,
                                 precision=lax.Precision.HIGHEST)
    g = lax.conv_general_dilated(x_nhwc, wg.reshape(3, 3, Cin, Cout), (1, 1),
                                 "SAME", dimension_numbers=dn,
                                 precision=lax.Precision.HIGHEST)
    return f * jax.nn.sigmoid(g)


def basic_block_reference(x_nchw, params):
    # Mirrors the kernel's bf16 quantization of matmul operands (inputs,
    # weights, and the layer-1 -> layer-2 activation) so the check isolates
    # the conv/gate/residual math rather than the dtype choice.
    q = lambda a: a.astype(jnp.bfloat16).astype(jnp.float32)
    x = q(jnp.transpose(x_nchw, (0, 2, 3, 1)))
    out1 = _ref_gated_conv(x, q(params["w1f"]), q(params["w1g"]))
    out2 = _ref_gated_conv(q(out1), q(params["w2f"]), q(params["w2g"]))
    out = jnp.maximum(out2 + x, 0.0)
    return jnp.transpose(out, (0, 3, 1, 2))


# --------------------------------------------------------------------- main --

if __name__ == "__main__":
    key = jax.random.PRNGKey(0)
    # inplanes == planes, stride=1, downsample=None; W*C = 128 -> lane-dense
    # rows; N=32 with nb=8 images/step -> grid of 4 (2 steps per TC on v7x).
    N, C, H, W = 32, 8, 16, 16
    k_x, k1f, k1g, k2f, k2g = jax.random.split(key, 5)

    fan_in = C * 3 * 3
    scale = 1.0 / jnp.sqrt(fan_in)
    params = {
        # conv weights stored as [tap = ky*3 + kx, Cin, Cout]
        "w1f": scale * jax.random.normal(k1f, (9, C, C), jnp.float32),
        "w1g": scale * jax.random.normal(k1g, (9, C, C), jnp.float32),
        "w2f": scale * jax.random.normal(k2f, (9, C, C), jnp.float32),
        "w2g": scale * jax.random.normal(k2g, (9, C, C), jnp.float32),
    }
    x = jax.random.normal(k_x, (N, C, H, W), jnp.float32)

    out = jax.block_until_ready(basic_block_forward(x, params))
    ref = jax.block_until_ready(basic_block_reference(x, params))

    assert out.shape == (N, C, H, W), out.shape
    max_err = float(jnp.max(jnp.abs(out - ref)))
    assert jnp.allclose(out, ref, atol=2e-2, rtol=2e-2), max_err
    print("KERNEL_OK")
</pallas_src>

<mosaic_0001>
module attributes {stable_mosaic.version = 11 : i64} {
  func.func @_basic_block_kernel(%arg0: i32, %arg1: memref<8x16x128xbf16, #tpu.memory_space<vmem>>, %arg2: memref<384x256xbf16, #tpu.memory_space<vmem>>, %arg3: memref<384x256xbf16, #tpu.memory_space<vmem>>, %arg4: memref<8x16x128xf32, #tpu.memory_space<vmem>>, %arg5: memref<8x18x128xf32, #tpu.memory_space<vmem>>) attributes {dimension_semantics = [#tpu.dimension_semantics<parallel>], iteration_bounds = array<i64: 4>, scalar_prefetch = 0 : i64, scratch_operands = 1 : i64, tpu.core_type = #tpu.core_type<tc>, window_params = [{transform_indices = @transform_0, window_bounds = array<i64: 8, 16, 128>}, {pipeline_mode = #tpu.pipeline_mode<synchronous>, transform_indices = @transform_1, window_bounds = array<i64: 384, 256>}, {pipeline_mode = #tpu.pipeline_mode<synchronous>, transform_indices = @transform_2, window_bounds = array<i64: 384, 256>}, {transform_indices = @transform_3, window_bounds = array<i64: 8, 16, 128>}]} {
    %c0 = arith.constant 0 : index
    %c0_0 = arith.constant 0 : index
    %c0_1 = arith.constant 0 : index
    %0 = vector.load %arg1[%c0, %c0_0, %c0_1] : memref<8x16x128xbf16, #tpu.memory_space<vmem>>, vector<8x16x128xbf16>
    %1 = arith.extf %0 : vector<8x16x128xbf16> to vector<8x16x128xf32>
    %cst = arith.constant 0.000000e+00 : f32
    %2 = vector.broadcast %cst : f32 to vector<8x1x128xf32>
    %c0_2 = arith.constant 0 : index
    %c0_3 = arith.constant 0 : index
    %c0_4 = arith.constant 0 : index
    %3 = vector.load %arg5[%c0_2, %c0_3, %c0_4] : memref<8x18x128xf32, #tpu.memory_space<vmem>>, vector<8x1x128xf32>
    tpu.vector_store %arg5[%c0_2, %c0_3, %c0_4], %2 {strides = array<i32>} : memref<8x18x128xf32, #tpu.memory_space<vmem>>, vector<8x1x128xf32>,
    %c0_5 = arith.constant 0 : index
    %c17 = arith.constant 17 : index
    %c0_6 = arith.constant 0 : index
    %4 = vector.load %arg5[%c0_5, %c17, %c0_6] : memref<8x18x128xf32, #tpu.memory_space<vmem>>, vector<8x1x128xf32>
    tpu.vector_store %arg5[%c0_5, %c17, %c0_6], %2 {strides = array<i32>} : memref<8x18x128xf32, #tpu.memory_space<vmem>>, vector<8x1x128xf32>,
    %c0_7 = arith.constant 0 : index
    %c1 = arith.constant 1 : index
    %c0_8 = arith.constant 0 : index
    %5 = vector.load %arg5[%c0_7, %c1, %c0_8] : memref<8x18x128xf32, #tpu.memory_space<vmem>>, vector<8x16x128xf32>
    tpu.vector_store %arg5[%c0_7, %c1, %c0_8], %1 {strides = array<i32>} : memref<8x18x128xf32, #tpu.memory_space<vmem>>, vector<8x16x128xf32>,
    %c0_9 = arith.constant 0 : index
    %c0_10 = arith.constant 0 : index
    %c0_11 = arith.constant 0 : index
    %6 = vector.load %arg5[%c0_9, %c0_10, %c0_11] : memref<8x18x128xf32, #tpu.memory_space<vmem>>, vector<8x16x128xf32>
    %c0_12 = arith.constant 0 : index
    %c1_13 = arith.constant 1 : index
    %c0_14 = arith.constant 0 : index
    %7 = vector.load %arg5[%c0_12, %c1_13, %c0_14] : memref<8x18x128xf32, #tpu.memory_space<vmem>>, vector<8x16x128xf32>
    %c0_15 = arith.constant 0 : index
    %c2 = arith.constant 2 : index
    %c0_16 = arith.constant 0 : index
    %8 = vector.load %arg5[%c0_15, %c2, %c0_16] : memref<8x18x128xf32, #tpu.memory_space<vmem>>, vector<8x16x128xf32>
    %9 = tpu.concatenate %6, %7, %8 in 2 : vector<8x16x128xf32>, vector<8x16x128xf32>, vector<8x16x128xf32> -> vector<8x16x384xf32>
    %10 = vector.shape_cast %9 : vector<8x16x384xf32> to vector<128x384xf32>
    %11 = arith.truncf %10 : vector<128x384xf32> to vector<128x384xbf16>
    %c0_17 = arith.constant 0 : index
    %c0_18 = arith.constant 0 : index
    %12 = vector.load %arg2[%c0_17, %c0_18] : memref<384x256xbf16, #tpu.memory_space<vmem>>, vector<384x256xbf16>
    %cst_19 = arith.constant dense<0.000000e+00> : vector<128x256xf32>
    %13 = tpu.matmul %11, %12, %cst_19 {dimension_numbers = #tpu.dot_dimension_numbers<[1], [0], [0], [1], [0, 0, 1, 1], [], []>} : vector<128x384xbf16>, vector<384x256xbf16>, vector<128x256xf32> -> vector<128x256xf32>
    %14 = vector.extract_strided_slice %13 {offsets = [0, 0], sizes = [128, 128], strides = [1, 1]} : vector<128x256xf32> to vector<128x128xf32>
    %15 = vector.extract_strided_slice %13 {offsets = [0, 128], sizes = [128, 128], strides = [1, 1]} : vector<128x256xf32> to vector<128x128xf32>
    %16 = arith.negf %15 : vector<128x128xf32>
    %17 = math.exp %16 : vector<128x128xf32>
    %cst_20 = arith.constant 1.000000e+00 : f32
    %18 = vector.broadcast %cst_20 : f32 to vector<128x128xf32>
    %19 = arith.addf %18, %17 : vector<128x128xf32>
    %20 = arith.divf %18, %19 : vector<128x128xf32>
    %21 = arith.mulf %14, %20 : vector<128x128xf32>
    %22 = vector.shape_cast %21 : vector<128x128xf32> to vector<8x16x128xf32>
    %c0_21 = arith.constant 0 : index
    %c1_22 = arith.constant 1 : index
    %c0_23 = arith.constant 0 : index
    %23 = vector.load %arg5[%c0_21, %c1_22, %c0_23] : memref<8x18x128xf32, #tpu.memory_space<vmem>>, vector<8x16x128xf32>
    tpu.vector_store %arg5[%c0_21, %c1_22, %c0_23], %22 {strides = array<i32>} : memref<8x18x128xf32, #tpu.memory_space<vmem>>, vector<8x16x128xf32>,
    %c0_24 = arith.constant 0 : index
    %c0_25 = arith.constant 0 : index
    %c0_26 = arith.constant 0 : index
    %24 = vector.load %arg5[%c0_24, %c0_25, %c0_26] : memref<8x18x128xf32, #tpu.memory_space<vmem>>, vector<8x16x128xf32>
    %c0_27 = arith.constant 0 : index
    %c1_28 = arith.constant 1 : index
    %c0_29 = arith.constant 0 : index
    %25 = vector.load %arg5[%c0_27, %c1_28, %c0_29] : memref<8x18x128xf32, #tpu.memory_space<vmem>>, vector<8x16x128xf32>
    %c0_30 = arith.constant 0 : index
    %c2_31 = arith.constant 2 : index
    %c0_32 = arith.constant 0 : index
    %26 = vector.load %arg5[%c0_30, %c2_31, %c0_32] : memref<8x18x128xf32, #tpu.memory_space<vmem>>, vector<8x16x128xf32>
    %27 = tpu.concatenate %24, %25, %26 in 2 : vector<8x16x128xf32>, vector<8x16x128xf32>, vector<8x16x128xf32> -> vector<8x16x384xf32>
    %28 = vector.shape_cast %27 : vector<8x16x384xf32> to vector<128x384xf32>
    %29 = arith.truncf %28 : vector<128x384xf32> to vector<128x384xbf16>
    %c0_33 = arith.constant 0 : index
    %c0_34 = arith.constant 0 : index
    %30 = vector.load %arg3[%c0_33, %c0_34] : memref<384x256xbf16, #tpu.memory_space<vmem>>, vector<384x256xbf16>
    %cst_35 = arith.constant dense<0.000000e+00> : vector<128x256xf32>
    %31 = tpu.matmul %29, %30, %cst_35 {dimension_numbers = #tpu.dot_dimension_numbers<[1], [0], [0], [1], [0, 0, 1, 1], [], []>} : vector<128x384xbf16>, vector<384x256xbf16>, vector<128x256xf32> -> vector<128x256xf32>
    %32 = vector.extract_strided_slice %31 {offsets = [0, 0], sizes = [128, 128], strides = [1, 1]} : vector<128x256xf32> to vector<128x128xf32>
    %33 = vector.extract_strided_slice %31 {offsets = [0, 128], sizes = [128, 128], strides = [1, 1]} : vector<128x256xf32> to vector<128x128xf32>
    %34 = arith.negf %33 : vector<128x128xf32>
    %35 = math.exp %34 : vector<128x128xf32>
    %cst_36 = arith.constant 1.000000e+00 : f32
    %36 = vector.broadcast %cst_36 : f32 to vector<128x128xf32>
    %37 = arith.addf %36, %35 : vector<128x128xf32>
    %38 = arith.divf %36, %37 : vector<128x128xf32>
    %39 = arith.mulf %32, %38 : vector<128x128xf32>
    %40 = vector.shape_cast %39 : vector<128x128xf32> to vector<8x16x128xf32>
    %41 = arith.addf %40, %1 : vector<8x16x128xf32>
    %cst_37 = arith.constant 0.000000e+00 : f32
    %42 = vector.broadcast %cst_37 : f32 to vector<8x16x128xf32>
    %43 = arith.maximumf %41, %42 : vector<8x16x128xf32>
    %c0_38 = arith.constant 0 : index
    %c0_39 = arith.constant 0 : index
    %c0_40 = arith.constant 0 : index
    %44 = vector.load %arg4[%c0_38, %c0_39, %c0_40] : memref<8x16x128xf32, #tpu.memory_space<vmem>>, vector<8x16x128xf32>
    tpu.vector_store %arg4[%c0_38, %c0_39, %c0_40], %43 {strides = array<i32>} : memref<8x16x128xf32, #tpu.memory_space<vmem>>, vector<8x16x128xf32>,
    return
  }
  func.func @transform_0(%arg0: i32) -> (i32, i32, i32) {
    %c0_i32 = arith.constant 0 : i32
    %c0_i32_0 = arith.constant 0 : i32
    %c0_i32_1 = arith.constant 0 : i32
    return %arg0, %c0_i32, %c0_i32_0 : i32, i32, i32
  }
  func.func @transform_1(%arg0: i32) -> (i32, i32) {
    %c0_i32 = arith.constant 0 : i32
    %c0_i32_0 = arith.constant 0 : i32
    %c0_i32_1 = arith.constant 0 : i32
    return %c0_i32, %c0_i32_0 : i32, i32
  }
  func.func @transform_2(%arg0: i32) -> (i32, i32) {
    %c0_i32 = arith.constant 0 : i32
    %c0_i32_0 = arith.constant 0 : i32
    %c0_i32_1 = arith.constant 0 : i32
    return %c0_i32, %c0_i32_0 : i32, i32
  }
  func.func @transform_3(%arg0: i32) -> (i32, i32, i32) {
    %c0_i32 = arith.constant 0 : i32
    %c0_i32_0 = arith.constant 0 : i32
    %c0_i32_1 = arith.constant 0 : i32
    return %arg0, %c0_i32, %c0_i32_0 : i32, i32, i32
  }
}

</mosaic_0001>

<bundles_post_ra>
// kernel: tpu_custom_call.1
= control target key start
LH: loop header
LB: loop body
LE: loop exit
PB: predicated region body
PF: predicated region fallthrough
CT: control target
= control target key end

     0   :  { %8 = vsyncpa [#allocation4], 0  ;;  %s3097_s0 = inlined_call_operand.hbm [shape: bf16[32,16,128], index: 0, kind: input, shape index: {}]   ;;  %s3098_s1 = inlined_call_operand.hbm [shape: bf16[384,256], index: 1, kind: input, shape index: {}]   ;;  %s3099_s2 = inlined_call_operand.hbm [shape: bf16[384,256], index: 2, kind: input, shape index: {}]   ;;  %s3100_s3 = inlined_call_operand.hbm [shape: f32[32,16,128], index: 3, kind: output, shape index: {}]  }
   0x1   :  { %10 = vsyncpa [#allocation4 + $0x1], 0 }
   0x2   :  { %11 = vsyncpa [#allocation7], 0 }
   0x3   :  { %12 = vsyncpa [#allocation5], 0 }
   0x4   :  { %14 = vsyncpa [#allocation5 + $0x1], 0  ;;  %s2653_s12 = smov 0   ;;  %s2655_s13 = smov 0  }
   0x5   :  { %s2657_s14 = smov 0   ;;  %s2659_s15 = smov 0  }
   0x6 LB: > { %s2674_s16 = sadd.s32 4294967295, %s2619_s15   ;;  %s1853_s17 = sadd.s32 4294967294, %s2619_s15   ;;  %s2619_s15 = sphi %s2659_s15, %s3119_s15   ;;  %s2615_s14 = sphi %s2657_s14, %s3118_s14   ;;  %s2611_s13 = sphi %s2655_s13, %s3117_s13   ;;  %s2607_s12 = sphi %s2653_s12, %s3116_s12  }
   0x7   : > { %p40_p0 = scmp.ne.s32.totalorder %s2611_s13, %s2607_s12  ;;  %p3101_p1 = scmp.eq.s32.totalorder %s2674_s16, 0 }
   0x8   : > { %p112_p3 = scmp.eq.s32.totalorder %s1853_s17, 3  ;;  %p1854_p5 = scmp.ge.s32.totalorder %s2619_s15, 1 }
   0x9   : > { %p2683_p4 = por %p3101_p1, %p40_p0  ;;  %p119_p7 = scmp.lt.s32.totalorder %s2619_s15, 5 }
   0xa   : > { %p2688_p6 = por %p112_p3, %p40_p0  ;;  %s2621_s21 = smov [#allocation6]  }
   0xb   : > { %s3104_s18 = scalar_select %p2683_p4, 1, 0 }
   0xc   : > { %s3105_s19 = scalar_select %p2688_p6, 1, 0 }
   0xd   : > { %p2693_p8 = pnand %p1854_p5, %p119_p7  ;;  %s131_s22 = sshll.u32 %s2621_s21, 4  ;;  %s132_s22 = int_to_ptr.vmem [resolvable:$true] %s131_s22 }
   0xe   : > { %s2622_s24 = smov [#allocation8]   ;;  %s2463_s28 = scalar_lea.hbm %s3098_s1, 6144 }
   0xf   : > { %s3106_s20 = scalar_select %p2693_p8, 1, 0 }
  0x10   : > { %p2120_p9 = pneg %p2693_p8  ;;  %s144_s25 = sshll.u32 %s2622_s24, 4  ;;  %s2705_s25 = int_to_ptr.vmem [resolvable:$true] %s144_s25 }
  0x11   : > { %p2464_p11 = scmp.ne.s32.totalorder %s3098_s1, %s2463_s28  ;;  %p2470_p3 = scmp.lt.u32.totalorder %s2463_s28, %s3098_s1 }
  0x12   : > { %p2701_p10 = pnand %p2120_p9, %p3101_p1 }
  0x14   : > { %p2465_p12 = pneg %p2701_p10 }
  0x16   : > { %p2466_p13 = pnand %p2465_p12, %p2464_p11 }
  0x18   : > { %p2467_p0 = pneg %p2466_p13 }
  0x1a   : > { %p2472_p5 = pnand %p2470_p3, %p2467_p0 }
  0x1c   : > { %2475 = shalt.err (!%p2472_p5)
}
  0x1d   : > { %s2476_s6 = scalar_lea.vmem %s132_s22, 6144  ;;  %p2484_p2 = scmp.lt.s32.totalorder %s132_s22, %s132_s22 }
  0x1e   : > { %p2477_p7 = scmp.ne.s32.totalorder %s132_s22, %s2476_s6  ;;  %p2485_p6 = scmp.lt.s32.totalorder %s2476_s6, %s2476_s6 }
  0x20   : > { %p2479_p9 = pnand %p2477_p7, %p2465_p12  ;;  %p2486_p4 = por %p2485_p6, %p2484_p2 }
  0x22   : > { %p2480_p1 = pneg %p2479_p9 }
  0x24   : > { %p2487_p8 = pnand %p2486_p4, %p2480_p1 }
  0x26   : > { %2490 = shalt.err (!%p2487_p8)
}
  0x27   : > { %s2623_s7 = smov 128   ;;  %s2624_s8 = smov 8  }
  0x28   : > { %2123 = dma.hbm_to_vmem [thread:$0]  (!%p2701_p10), %s3098_s1, 6144, %s132_s22, [#allocation7], %s2623_s7, %s2623_s7, %s2624_s8  }
  0x29   : > { %s2491_s21 = scalar_lea.hbm %s3099_s2, 6144 }
  0x2a   : > { %p2492_p11 = scmp.ne.s32.totalorder %s3099_s2, %s2491_s21  ;;  %p2498_p4 = scmp.lt.u32.totalorder %s2491_s21, %s3099_s2 }
  0x2c   : > { %p2494_p1 = pnand %p2492_p11, %p2465_p12 }
  0x2e   : > { %p2495_p2 = pneg %p2494_p1 }
  0x30   : > { %p2500_p6 = pnand %p2498_p4, %p2495_p2 }
  0x32   : > { %2503 = shalt.err (!%p2500_p6)
}
  0x33   : > { %s2504_s22 = scalar_lea.vmem %s2705_s25, 6144  ;;  %p2512_p3 = scmp.lt.s32.totalorder %s2705_s25, %s2705_s25 }
  0x34   : > { %p2505_p8 = scmp.ne.s32.totalorder %s2705_s25, %s2504_s22  ;;  %p2513_p5 = scmp.lt.s32.totalorder %s2504_s22, %s2504_s22 }
  0x36   : > { %p2507_p13 = pnand %p2505_p8, %p2465_p12  ;;  %p2514_p7 = por %p2513_p5, %p2512_p3 }
  0x38   : > { %p2508_p0 = pneg %p2507_p13 }
  0x3a   : > { %p2515_p9 = pnand %p2514_p7, %p2508_p0 }
  0x3c   : > { %2518 = shalt.err (!%p2515_p9)
}
  0x3d   : > { %2126 = dma.hbm_to_vmem [thread:$0]  (!%p2701_p10), %s3099_s2, 6144, %s2705_s25, [#allocation7], %s2623_s7, %s2623_s7, %s2624_s8  }
  0x3e   : > { %s2755_s4 = sadd.s32 1, %s2619_s15   ;;  %s27_s23 = sadd.s32 1, %s2615_s14 }
  0x3f   : > { %s24_s5 = ssub.s32 %s2619_s15, %s2755_s4  ;;  %p34_p12 = scmp.ne.s32.totalorder %s2615_s14, %s2611_s13 }
  0x40   : > { %p25_p11 = scmp.eq.s32.totalorder %s24_s5, 0  ;;  %p35_p1 = scmp.eq.s32.totalorder %s2619_s15, 0 }
  0x41   : > { %p3108_p2 = scmp.eq.s32.totalorder %s2674_s16, 3  ;;  %p2137_p6 = scmp.lt.s32.totalorder %s2619_s15, 4 }
  0x42   : > { %s2771_s9 = scalar_select %p25_p11, %s2615_s14, %s27_s23  }
  0x43   : > { %p2765_p4 = por %p3108_p2, %p34_p12  ;;  %p36_p8 = por %p35_p1, %p34_p12 }
  0x44   : > { %s158_s10 = sand.u32 1, %s2615_s14   ;;  %s2002_s25 = sshll.u32 %s2619_s15, 10 }
  0x45   : > { %s1858_s11 = sshll.u32 %s158_s10, 6  ;;  %s2778_s17 = scalar_lea.hbm %s3097_s0, %s2002_s25 }
  0x46   : > { %s162_s21 = scalar_lea.vmem [#allocation3], %s1858_s11  ;;  %p2782_p10 = pnand %p2137_p6, %p36_p8 }
  0x47   : > { %s170_s24 = sshll.u32 %s162_s21, 4  ;;  %s2786_s27 = scalar_lea.sflag [#allocation4], %s158_s10  ;;  %s2780_s24 = int_to_ptr.vmem [resolvable:$true] %s170_s24 }
  0x48   : > { %s2519_s28 = scalar_lea.hbm %s2778_s17, 1024  ;;  %p2521_p0 = pneg %p2782_p10 }
  0x49   : > { %p2520_p13 = scmp.ne.s32.totalorder %s2778_s17, %s2519_s28  ;;  %s2524_s30 = scalar_lea.hbm %s3097_s0, 4096 }
  0x4a   : > { %p2525_p7 = scmp.lt.u32.totalorder %s2778_s17, %s3097_s0  ;;  %p2526_p9 = scmp.lt.u32.totalorder %s2524_s30, %s2519_s28 }
  0x4b   : > { %p2522_p3 = pnand %p2521_p0, %p2520_p13  ;;  %p2528_p11 = scmp.lt.u32.totalorder %s2519_s28, %s2778_s17 }
  0x4c   : > { %p2527_p12 = por %p2526_p9, %p2525_p7 }
  0x4d   : > { %p2523_p5 = pneg %p2522_p3 }
  0x4e   : > { %p2529_p1 = por %p2528_p11, %p2527_p12 }
  0x50   : > { %p2530_p2 = pnand %p2529_p1, %p2523_p5 }
  0x52   : > { %2533 = shalt.err (!%p2530_p2)
}
  0x53   : > { %s2534_s10 = scalar_lea.vmem %s2780_s24, 1024  ;;  %s2625_s11 = smov [#allocation3]  }
  0x54   : > { %p2535_p6 = scmp.ne.s32.totalorder %s2780_s24, %s2534_s10  ;;  %s2539_s25 = sshll.u32 %s2625_s11, 4  ;;  %s2540_s25 = int_to_ptr.vmem [resolvable:$false] %s2539_s25 }
  0x55   : > { %s2541_s7 = scalar_lea.vmem %s2540_s25, 2048  ;;  %p2542_p3 = scmp.lt.s32.totalorder %s2780_s24, %s2540_s25 }
  0x56   : > { %p2537_p8 = pnand %p2535_p6, %p2521_p0  ;;  %p2543_p7 = scmp.lt.s32.totalorder %s2541_s7, %s2534_s10 }
  0x58   : > { %p2538_p13 = pneg %p2537_p8  ;;  %p2544_p9 = por %p2543_p7, %p2542_p3 }
  0x5a   : > { %p2545_p12 = pnand %p2544_p9, %p2538_p13 }
  0x5c   : > { %2548 = shalt.err (!%p2545_p12)
}
  0x5d   : > { %s2626_s8 = smov 64   ;;  %s2627_s21 = smov 4  }
  0x5e   : > { %2130 = dma.hbm_to_vmem [thread:$0]  (!%p2782_p10), %s2778_s17, 1024, %s2780_s24, %s2786_s27, %s2626_s8, %s2626_s8, %s2627_s21  }
  0x5f   : > { %p3111_p0 = scmp.ne.s32.totalorder %s3106_s20, 0 }
  0x60   : > { %s2817_s28 = sand.u32 (!%p3111_p0), 1, %s2611_s13   ;;  %p3112_p5 = scmp.ne.s32.totalorder (!%p3111_p0), %s3104_s18, 0 }
  0x61   : > { %182 = sbr.rel (%p3111_p0) target bundleno = 872 (0x368), region = 32  ;;  %s1863_s22 = sshll.u32 (!%p3111_p0), %s2817_s28, 6 }
  0x62   : > { %s185_s29 = scalar_lea.sflag (!%p3111_p0), [#allocation4], %s2817_s28  ;;  %s2821_s30 = scalar_lea.vmem (!%p3111_p0), [#allocation3], %s1863_s22 }
  0x68   : > { %2594 = dma.done.wait (%p3112_p5), %s185_s29, 1024  }
  0x69   : > { %2596 = vsyncadd (%p3112_p5), %s185_s29, 4294966272  ;;  %p3113_p10 = scmp.eq.s32.totalorder %s2674_s16, 0 }
  0x6b   : > { %2598 = dma.done.wait (%p3113_p10), [#allocation7], 12288   ;;  %p3114_p11 = pmov %p3113_p10 }
  0x6c   : > { %v2628_v0 = vmov 0.0   ;;  %v2183_v1 = vld [vmem:[#allocation6 + $0x4] ss:$8 sps:$4 sm:$0xff]   ;;  %v2185_v2 = vld [vmem:[#allocation6] ss:$8 sps:$4 sm:$0xff]   ;;  %v2847_v23 = vld [vmem:[%s2821_s30 + $0x10] sm:$0xff]  }
  0x6d   : > { %2600 = vsyncadd (%p3114_p11), [#allocation7], 4294955008  ;;  %254 = vst [vmem:[#allocation2] sm:$0x1] %v2628_v0  ;;  %646 = vmatprep.subr.bf16.mxu0 %v2183_v1  ;;  %v2186_v3 = vld [vmem:[#allocation6 + $0x14] ss:$8 sps:$4 sm:$0xff]   ;;  %v2015_v24 = vunpack.c.l.bf16 %v2847_v23  ;;  %v2016_v25 = vunpack.c.h.bf16 %v2847_v23 }
  0x6e   : > { %255 = vst [vmem:[#allocation2 + $0x18] sm:$0x1] %v2628_v0  ;;  %256 = vst [vmem:[#allocation2 + $0x30] sm:$0x1] %v2628_v0  ;;  %647 = vmatpush1.bf16.msra.mxu0 %v2185_v2  ;;  %v2188_v4 = vld [vmem:[#allocation6 + $0x10] ss:$8 sps:$4 sm:$0xff]  }
  0x6f   : > { %257 = vst [vmem:[#allocation2 + $0x48] sm:$0x1] %v2628_v0  ;;  %258 = vst [vmem:[#allocation2 + $0x60] sm:$0x1] %v2628_v0  ;;  %648 = vmatprep.subr.bf16.mxu0 %v2186_v3  ;;  %v2189_v5 = vld [vmem:[#allocation6 + $0x24] ss:$8 sps:$4 sm:$0xff]  }
  0x70   : > { %259 = vst [vmem:[#allocation2 + $0x78] sm:$0x1] %v2628_v0  ;;  %260 = vst [vmem:[#allocation2 + $0x90] sm:$0x1] %v2628_v0  ;;  %v2191_v6 = vld [vmem:[#allocation6 + $0x20] ss:$8 sps:$4 sm:$0xff]  }
  0x71   : > { %261 = vst [vmem:[#allocation2 + $0xa8] sm:$0x1] %v2628_v0  ;;  %262 = vst [vmem:[#allocation2 + $0x11] sm:$0x1] %v2628_v0  ;;  %v2192_v7 = vld [vmem:[#allocation6 + $0x34] ss:$8 sps:$4 sm:$0xff]  }
  0x72   : > { %263 = vst [vmem:[#allocation2 + $0x29] sm:$0x1] %v2628_v0  ;;  %264 = vst [vmem:[#allocation2 + $0x41] sm:$0x1] %v2628_v0  ;;  %649 = vmatpush1.bf16.msra.mxu0 %v2188_v4  ;;  %v2194_v8 = vld [vmem:[#allocation6 + $0x30] ss:$8 sps:$4 sm:$0xff]  }
  0x73   : > { %265 = vst [vmem:[#allocation2 + $0x59] sm:$0x1] %v2628_v0  ;;  %266 = vst [vmem:[#allocation2 + $0x71] sm:$0x1] %v2628_v0  ;;  %650 = vmatprep.subr.bf16.mxu0 %v2189_v5  ;;  %v2195_v9 = vld [vmem:[#allocation6 + $0x44] ss:$8 sps:$4 sm:$0xff]  }
  0x74   : > { %267 = vst [vmem:[#allocation2 + $0x89] sm:$0x1] %v2628_v0  ;;  %268 = vst [vmem:[#allocation2 + $0xa1] sm:$0x1] %v2628_v0  ;;  %v2197_v10 = vld [vmem:[#allocation6 + $0x40] ss:$8 sps:$4 sm:$0xff]  }
  0x75   : > { %269 = vst [vmem:[#allocation2 + $0xb9] sm:$0x1] %v2628_v0  ;;  %v2198_v11 = vld [vmem:[#allocation6 + $0x54] ss:$8 sps:$4 sm:$0xff]   ;;  %v2200_v12 = vld [vmem:[#allocation6 + $0x50] ss:$8 sps:$4 sm:$0xff]  }
  0x76   : > { %651 = vmatpush1.bf16.msra.mxu0 %v2191_v6  ;;  %v2201_v13 = vld [vmem:[#allocation6 + $0x64] ss:$8 sps:$4 sm:$0xff]   ;;  %v2203_v18 = vld [vmem:[#allocation6 + $0x60] ss:$8 sps:$4 sm:$0xff]   ;;  %v2204_v20 = vld [vmem:[#allocation6 + $0x74] ss:$8 sps:$4 sm:$0xff]  }
  0x77   : > { %652 = vmatprep.subr.bf16.mxu0 %v2192_v7  ;;  %v2832_v14 = vld [vmem:[%s2821_s30] sm:$0xff]   ;;  %v2838_v19 = vld [vmem:[%s2821_s30 + $0x8] sm:$0xff]   ;;  %v2206_v26 = vld [vmem:[#allocation6 + $0x70] ss:$8 sps:$4 sm:$0xff]   ;;  %274 = vst [vmem:[#allocation2 + $0x31] sm:$0xff] %v2015_v24  ;;  %s1866_s18 = sshll.u32 %s2817_s28, 7 }
  0x78   : > { %v2231_v15 = vld [vmem:[%s2821_s30] sm:$0xff]  ;;  %v2007_v16 = vunpack.c.l.bf16 %v2832_v14  ;;  %v2008_v17 = vunpack.c.h.bf16 %v2832_v14  ;;  %v2011_v21 = vunpack.c.l.bf16 %v2838_v19  ;;  %v2012_v22 = vunpack.c.h.bf16 %v2838_v19  ;;  %v2856_v27 = vld [vmem:[%s2821_s30 + $0x18] sm:$0xff]   ;;  %275 = vst [vmem:[#allocation2 + $0x39] sm:$0xff] %v2016_v25  ;;  %v2878_v36 = vld [vmem:[%s2821_s30 + $0x28] sm:$0xff]   ;;  %s2980_s20 = scalar_lea.vmem [#allocation9], %s1866_s18  ;;  %s2004_s17 = sshll.u32 %s2674_s16, 11 }
  0x79   : > { %678 = vmatprep.mubr.bf16.mxu0 %v2231_v15  ;;  %v2207_v28 = vld [vmem:[#allocation6 + $0x84] ss:$8 sps:$4 sm:$0xff]   ;;  %v2019_v29 = vunpack.c.l.bf16 %v2856_v27  ;;  %v2020_v30 = vunpack.c.h.bf16 %v2856_v27  ;;  %v2209_v34 = vld [vmem:[#allocation6 + $0x80] ss:$8 sps:$4 sm:$0xff]   ;;  %v2210_v35 = vld [vmem:[#allocation6 + $0x94] ss:$8 sps:$4 sm:$0xff]   ;;  %v2027_v37 = vunpack.c.l.bf16 %v2878_v36  ;;  %v2028_v38 = vunpack.c.h.bf16 %v2878_v36  ;;  %s3050_s23 = scalar_lea.hbm %s3100_s3, %s2004_s17 }
  0x7a   : > { %653 = vmatpush1.bf16.msra.mxu0 %v2194_v8  ;;  %270 = vst [vmem:[#allocation2 + $0x1] sm:$0xff] %v2007_v16  ;;  %271 = vst [vmem:[#allocation2 + $0x9] sm:$0xff] %v2008_v17  ;;  %v2865_v31 = vld [vmem:[%s2821_s30 + $0x20] sm:$0xff]   ;;  %v2883_v39 = vld [vmem:[%s2821_s30 + $0x30] sm:$0xff]   ;;  %s1761_s24 = sshll.u32 %s2980_s20, 4  ;;  %s1747_s5 = scalar_lea.sflag [#allocation5], %s2817_s28  ;;  %s3052_s24 = int_to_ptr.vmem [resolvable:$true] %s1761_s24 }
  0x7b   : > { %654 = vmatprep.subr.bf16.mxu0 %v2195_v9  ;;  %272 = vst [vmem:[#allocation2 + $0x19] sm:$0xff] %v2011_v21  ;;  %273 = vst [vmem:[#allocation2 + $0x21] sm:$0xff] %v2012_v22  ;;  %v2023_v32 = vunpack.c.l.bf16 %v2865_v31  ;;  %v2024_v33 = vunpack.c.h.bf16 %v2865_v31  ;;  %v2212_v40 = vld [vmem:[#allocation6 + $0x90] ss:$8 sps:$4 sm:$0xff]   ;;  %v2031_v41 = vunpack.c.l.bf16 %v2883_v39  ;;  %v2032_v42 = vunpack.c.h.bf16 %v2883_v39  ;;  %v2213_v43 = vld [vmem:[#allocation6 + $0xa4] ss:$8 sps:$4 sm:$0xff]  }
  0x7c   : > { %276 = vst [vmem:[#allocation2 + $0x49] sm:$0xff] %v2019_v29  ;;  %277 = vst [vmem:[#allocation2 + $0x51] sm:$0xff] %v2020_v30  ;;  %v2896_v44 = vld [vmem:[%s2821_s30 + $0x38] sm:$0xff]   ;;  %v2215_v45 = vld [vmem:[#allocation6 + $0xa0] ss:$8 sps:$4 sm:$0xff]   ;;  %s2549_s16 = scalar_lea.vmem %s3052_s24, 2048 }
  0x7d   : > { %278 = vst [vmem:[#allocation2 + $0x61] sm:$0xff] %v2023_v32  ;;  %279 = vst [vmem:[#allocation2 + $0x69] sm:$0xff] %v2024_v33  ;;  %v2035_v46 = vunpack.c.l.bf16 %v2896_v44  ;;  %v2036_v47 = vunpack.c.h.bf16 %v2896_v44  ;;  %v2216_v48 = vld [vmem:[#allocation6 + $0xb4] ss:$8 sps:$4 sm:$0xff]   ;;  %v2218_v49 = vld [vmem:[#allocation6 + $0xb0] ss:$8 sps:$4 sm:$0xff]   ;;  %p2550_p1 = scmp.ne.s32.totalorder %s3052_s24, %s2549_s16 }
  0x7e   : > { %655 = vmatpush1.bf16.msra.mxu0 %v2197_v10  ;;  %280 = vst [vmem:[#allocation2 + $0x79] sm:$0xff] %v2027_v37  ;;  %281 = vst [vmem:[#allocation2 + $0x81] sm:$0xff] %v2028_v38  ;;  %v2219_v50 = vld [vmem:[#allocation6 + $0xc4] ss:$8 sps:$4 sm:$0xff]   ;;  %v2221_v51 = vld [vmem:[#allocation6 + $0xc0] ss:$8 sps:$4 sm:$0xff]  }
  0x7f   : > { %656 = vmatprep.subr.bf16.mxu0 %v2198_v11  ;;  %282 = vst [vmem:[#allocation2 + $0x91] sm:$0xff] %v2031_v41  ;;  %283 = vst [vmem:[#allocation2 + $0x99] sm:$0xff] %v2032_v42  ;;  %v2222_v52 = vld [vmem:[#allocation6 + $0xd4] ss:$8 sps:$4 sm:$0xff]   ;;  %v2224_v53 = vld [vmem:[#allocation6 + $0xd0] ss:$8 sps:$4 sm:$0xff]   ;;  %p2551_p2 = pnand %p2550_p1, %p2765_p4 }
  0x80   : > { %284 = vst [vmem:[#allocation2 + $0xa9] sm:$0xff] %v2035_v46  ;;  %285 = vst [vmem:[#allocation2 + $0xb1] sm:$0xff] %v2036_v47  ;;  %v2225_v54 = vld [vmem:[#allocation6 + $0xe4] ss:$8 sps:$4 sm:$0xff]   ;;  %v2227_v55 = vld [vmem:[#allocation6 + $0xe0] ss:$8 sps:$4 sm:$0xff]  }
  0x81   : > { %v2228_v56 = vld [vmem:[#allocation6 + $0xf4] ss:$8 sps:$4 sm:$0xff]   ;;  %v2263_v57 = vld [vmem:[#allocation8 + $0x4] ss:$8 sps:$4 sm:$0xff]   ;;  %v2265_v58 = vld [vmem:[#allocation8] ss:$8 sps:$4 sm:$0xff]   ;;  %p2552_p6 = pneg %p2551_p2 }
  0x82   : > { %657 = vmatpush1.bf16.msra.mxu0 %v2200_v12  ;;  %v2266_v59 = vld [vmem:[#allocation8 + $0x14] ss:$8 sps:$4 sm:$0xff]   ;;  %v2230_v60 = vld [vmem:[#allocation6 + $0xf0] ss:$8 sps:$4 sm:$0xff]   ;;  %v286_v61 = vld [vmem:[#allocation2] sm:$0xff]  ;;  %1360 = vmatprep.subr.bf16.mxu1 %v2263_v57  ;;  %s2630_s10 = smov [#allocation9]  }
  0x83   : > { %658 = vmatprep.subr.bf16.mxu0 %v2201_v13  ;;  %v287_v62 = vld [vmem:[#allocation2 + $0x8] sm:$0xff]  ;;  %1361 = vmatpush1.bf16.msra.mxu1 %v2265_v58  ;;  %v2268_v2 = vld [vmem:[#allocation8 + $0x10] ss:$8 sps:$4 sm:$0xff]   ;;  %v2238_v5 = vld [vmem:[#allocation6 + $0x114] ss:$8 sps:$4 sm:$0xff]   ;;  %s2553_s11 = sshll.u32 %s2630_s10, 4  ;;  %s2554_s11 = int_to_ptr.vmem [resolvable:$false] %s2553_s11 }
  0x84   : > { %v2234_v63 = vld [vmem:[#allocation6 + $0x104] ss:$8 sps:$4 sm:$0xff]   ;;  %v2232_v0 = vld [vmem:[#allocation6 + $0x100] ss:$8 sps:$4 sm:$0xff]   ;;  %v334_v4 = vpack.c.bf16 %v287_v62, %v286_v61  ;;  %1362 = vmatprep.subr.bf16.mxu1 %v2266_v59  ;;  %v2272_v7 = vld [vmem:[#allocation8 + $0x34] ss:$8 sps:$4 sm:$0xff]   ;;  %p2556_p8 = scmp.lt.s32.totalorder %s3052_s24, %s2554_s11 }
  0x85   : > { %v2235_v1 = vld [vmem:[%s2821_s30 + $0x8] sm:$0xff]  ;;  %v288_v8 = vld [vmem:[#allocation2 + $0x18] sm:$0xff]  ;;  %v289_v10 = vld [vmem:[#allocation2 + $0x20] sm:$0xff]  ;;  %s2555_s25 = scalar_lea.vmem %s2554_s11, 4096 }
  0x86   : > { %659 = vmatpush1.bf16.msra.mxu0 %v2203_v18  ;;  %v2269_v3 = vld [vmem:[#allocation8 + $0x24] ss:$8 sps:$4 sm:$0xff]   ;;  %v2271_v6 = vld [vmem:[#allocation8 + $0x20] ss:$8 sps:$4 sm:$0xff]   ;;  %v2236_v9 = vld [vmem:[#allocation6 + $0x110] ss:$8 sps:$4 sm:$0xff]   ;;  %v337_v13 = vpack.c.bf16 %v289_v10, %v288_v8  ;;  %p2557_p13 = scmp.lt.s32.totalorder %s2555_s25, %s2549_s16 }
  0x87   : > { %660 = vmatprep.subr.bf16.mxu0 %v2204_v20  ;;  %1363 = vmatpush1.bf16.msra.mxu1 %v2268_v2  ;;  %v2242_v11 = vld [vmem:[#allocation6 + $0x124] ss:$8 sps:$4 sm:$0xff]   ;;  %v2274_v12 = vld [vmem:[#allocation8 + $0x30] ss:$8 sps:$4 sm:$0xff]   ;;  %v2240_v20 = vld [vmem:[#allocation6 + $0x120] ss:$8 sps:$4 sm:$0xff]  }
  0x88   : > { %1364 = vmatprep.subr.bf16.mxu1 %v2269_v3  ;;  %v2275_v15 = vld [vmem:[#allocation8 + $0x44] ss:$8 sps:$4 sm:$0xff]   ;;  %v2239_v18 = vld [vmem:[%s2821_s30 + $0x10] sm:$0xff]  ;;  %v2256_v58 = vld [vmem:[#allocation6 + $0x160] ss:$8 sps:$4 sm:$0xff]   ;;  %p2558_p3 = por %p2557_p13, %p2556_p8 }
  0x89   : > { %v2247_v57 = vld [vmem:[%s2821_s30 + $0x20] sm:$0xff]  ;;  %v2262_v59 = vld [vmem:[#allocation6 + $0x174] ss:$8 sps:$4 sm:$0xff]   ;;  %v295_v61 = vld [vmem:[#allocation2 + $0x68] sm:$0xff] }
  0x8a   : > { %661 = vmatpush1.bf16.msra.mxu0 %v2206_v26  ;;  %v2246_v26 = vld [vmem:[#allocation6 + $0x134] ss:$8 sps:$4 sm:$0xff]   ;;  %v2260_v62 = vld [vmem:[#allocation6 + $0x170] ss:$8 sps:$4 sm:$0xff]   ;;  %v297_v2 = vld [vmem:[#allocation2 + $0x80] sm:$0xff]  ;;  %p2559_p7 = pnand %p2558_p3, %p2552_p6 }
  0x8b   : > { %662 = vmatprep.subr.bf16.mxu0 %v2207_v28  ;;  %1365 = vmatpush1.bf16.msra.mxu1 %v2271_v6  ;;  %v2277_v28 = vld [vmem:[#allocation8 + $0x40] ss:$8 sps:$4 sm:$0xff]   ;;  %v299_v6 = vld [vmem:[#allocation2 + $0x98] sm:$0xff]  ;;  %v301_v10 = vld [vmem:[#allocation2 + $0xb0] sm:$0xff] }
  0x8c   : > { %1366 = vmatprep.subr.bf16.mxu1 %v2272_v7  ;;  %v2259_v8 = vld [vmem:[%s2821_s30 + $0x38] sm:$0xff] }
  0x8e   : > { %663 = vmatpush1.bf16.msra.mxu0 %v2209_v34  ;;  %v2278_v34 = vld [vmem:[#allocation8 + $0x54] ss:$8 sps:$4 sm:$0xff]  }
  0x8f   : > { %664 = vmatprep.subr.bf16.mxu0 %v2210_v35  ;;  %1367 = vmatpush1.bf16.msra.mxu1 %v2274_v12  ;;  %v290_v35 = vld [vmem:[#allocation2 + $0x30] sm:$0xff]  ;;  %v2629_v12 = vmov 0  }
  0x90   : > { %1368 = vmatprep.subr.bf16.mxu1 %v2275_v15  ;;  %v319_v15 = vld [vmem:[#allocation2 + $0xa] sm:$0xff] }
  0x92   : > { %665 = vmatpush1.bf16.msra.mxu0 %v2212_v40  ;;  %v291_v40 = vld [vmem:[#allocation2 + $0x38] sm:$0xff] }
  0x93   : > { %666 = vmatprep.subr.bf16.mxu0 %v2213_v43  ;;  %v2244_v43 = vld [vmem:[#allocation6 + $0x130] ss:$8 sps:$4 sm:$0xff]   ;;  %1369 = vmatpush1.bf16.msra.mxu1 %v2277_v28 }
  0x94   : > { %1370 = vmatprep.subr.bf16.mxu1 %v2278_v34  ;;  %v322_v34 = vld [vmem:[#allocation2 + $0x32] sm:$0xff] }
  0x96   : > { %667 = vmatpush1.bf16.msra.mxu0 %v2215_v45  ;;  %v2250_v45 = vld [vmem:[#allocation6 + $0x144] ss:$8 sps:$4 sm:$0xff]  }
  0x97   : > { %668 = vmatprep.subr.bf16.mxu0 %v2216_v48  ;;  %v340_v48 = vpack.c.bf16 %v291_v40, %v290_v35  ;;  %v323_v35 = vld [vmem:[#allocation2 + $0x3a] sm:$0xff] }
  0x98   : > { %v342_v40 = vpack.c.bf16 %v323_v35, %v322_v34  ;;  %v2313_v34 = vld [vmem:[#allocation8 + $0x104] ss:$8 sps:$4 sm:$0xff]  }
  0x9a   : > { %669 = vmatpush1.bf16.msra.mxu0 %v2218_v49  ;;  %v2243_v49 = vld [vmem:[%s2821_s30 + $0x18] sm:$0xff] }
  0x9b   : > { %670 = vmatprep.subr.bf16.mxu0 %v2219_v50  ;;  %v2248_v50 = vld [vmem:[#allocation6 + $0x140] ss:$8 sps:$4 sm:$0xff]  }
  0x9e   : > { %671 = vmatpush1.bf16.msra.mxu0 %v2221_v51  ;;  %v2254_v51 = vld [vmem:[#allocation6 + $0x154] ss:$8 sps:$4 sm:$0xff]  }
  0x9f   : > { %672 = vmatprep.subr.bf16.mxu0 %v2222_v52  ;;  %v292_v52 = vld [vmem:[#allocation2 + $0x48] sm:$0xff] }
  0xa2   : > { %673 = vmatpush1.bf16.msra.mxu0 %v2224_v53  ;;  %v293_v53 = vld [vmem:[#allocation2 + $0x50] sm:$0xff] }
  0xa3   : > { %674 = vmatprep.subr.bf16.mxu0 %v2225_v54  ;;  %v2252_v54 = vld [vmem:[#allocation6 + $0x150] ss:$8 sps:$4 sm:$0xff]  }
  0xa6   : > { %675 = vmatpush1.bf16.msra.mxu0 %v2227_v55  ;;  %v2258_v55 = vld [vmem:[#allocation6 + $0x164] ss:$8 sps:$4 sm:$0xff]  }
  0xa7   : > { %676 = vmatprep.subr.bf16.mxu0 %v2228_v56  ;;  %v343_v56 = vpack.c.bf16 %v293_v53, %v292_v52  ;;  %v328_v52 = vld [vmem:[#allocation2 + $0x7a] sm:$0xff]  ;;  %v329_v53 = vld [vmem:[#allocation2 + $0x82] sm:$0xff] }
  0xaa   : > { %677 = vmatpush1.bf16.msra.mxu0 %v2230_v60  ;;  %v294_v60 = vld [vmem:[#allocation2 + $0x60] sm:$0xff] }
  0xab   : > { %759 = vmatprep.subr.bf16.mxu0 %v2234_v63  ;;  %v346_v63 = vpack.c.bf16 %v295_v61, %v294_v60  ;;  %v2280_v61 = vld [vmem:[#allocation8 + $0x50] ss:$8 sps:$4 sm:$0xff]  }
  0xac   : > { %1371 = vmatpush1.bf16.msra.mxu1 %v2280_v61 }
  0xad   : > { %679 = vmatmul.mubr.bf16.vlgmr.msra.gmra.mrb[0].mxu0 %v334_v4  ;;  %v2255_v4 = vld [vmem:[%s2821_s30 + $0x30] sm:$0xff] }
  0xae   : > { %760 = vmatpush1.bf16.msra.mxu0 %v2232_v0  ;;  %688 = vmatprep.mubr.bf16.mxu0 %v2235_v1  ;;  %v2251_v0 = vld [vmem:[%s2821_s30 + $0x28] sm:$0xff]  ;;  %v296_v1 = vld [vmem:[#allocation2 + $0x78] sm:$0xff] }
  0xaf   : > { %761 = vmatprep.subr.bf16.mxu0 %v2238_v5  ;;  %v349_v3 = vpack.c.bf16 %v297_v2, %v296_v1  ;;  %v298_v5 = vld [vmem:[#allocation2 + $0x90] sm:$0xff]  ;;  %v2287_v2 = vld [vmem:[#allocation8 + $0x84] ss:$8 sps:$4 sm:$0xff]  }
  0xb0   : > { %v352_v7 = vpack.c.bf16 %v299_v6, %v298_v5  ;;  %v2286_v1 = vld [vmem:[#allocation8 + $0x70] ss:$8 sps:$4 sm:$0xff]   ;;  %v2293_v6 = vld [vmem:[#allocation8 + $0xa4] ss:$8 sps:$4 sm:$0xff]  }
  0xb1   : > { %v2292_v5 = vld [vmem:[#allocation8 + $0x90] ss:$8 sps:$4 sm:$0xff]  }
  0xb2   : > { %762 = vmatpush1.bf16.msra.mxu0 %v2236_v9  ;;  %v300_v9 = vld [vmem:[#allocation2 + $0xa8] sm:$0xff] }
  0xb3   : > { %763 = vmatprep.subr.bf16.mxu0 %v2242_v11  ;;  %v355_v11 = vpack.c.bf16 %v301_v10, %v300_v9  ;;  %v2298_v9 = vld [vmem:[#allocation8 + $0xb0] ss:$8 sps:$4 sm:$0xff]   ;;  %v2299_v10 = vld [vmem:[#allocation8 + $0xc4] ss:$8 sps:$4 sm:$0xff]  }
  0xb5   : > { %689 = vmatmul.mubr.bf16.gmra.mrb[4].mxu0 %v337_v13  ;;  %v318_v13 = vld [vmem:[#allocation2 + $0x2] sm:$0xff] }
  0xb6   : > { %698 = vmatprep.mubr.bf16.mxu0 %v2239_v18  ;;  %764 = vmatpush1.bf16.msra.mxu0 %v2240_v20  ;;  %v336_v18 = vpack.c.bf16 %v319_v15, %v318_v13  ;;  %v320_v20 = vld [vmem:[#allocation2 + $0x1a] sm:$0xff] }
  0xb7   : > { %765 = vmatprep.subr.bf16.mxu0 %v2246_v26  ;;  %v321_v26 = vld [vmem:[#allocation2 + $0x22] sm:$0xff]  ;;  %v2302_v13 = vld [vmem:[#allocation8 + $0xd4] ss:$8 sps:$4 sm:$0xff]   ;;  %v2304_v15 = vld [vmem:[#allocation8 + $0xd0] ss:$8 sps:$4 sm:$0xff]  }
  0xb8   : > { %v339_v28 = vpack.c.bf16 %v321_v26, %v320_v20  ;;  %v2307_v20 = vld [vmem:[#allocation8 + $0xe0] ss:$8 sps:$4 sm:$0xff]   ;;  %v2308_v26 = vld [vmem:[#allocation8 + $0xf4] ss:$8 sps:$4 sm:$0xff]  }
  0xba   : > { %766 = vmatpush1.bf16.msra.mxu0 %v2244_v43  ;;  %v324_v43 = vld [vmem:[#allocation2 + $0x4a] sm:$0xff] }
  0xbb   : > { %767 = vmatprep.subr.bf16.mxu0 %v2250_v45  ;;  %v325_v45 = vld [vmem:[#allocation2 + $0x52] sm:$0xff] }
  0xbd   : > { %699 = vmatmul.mubr.bf16.gmra.mrb[8].mxu0 %v340_v48  ;;  %v345_v48 = vpack.c.bf16 %v325_v45, %v324_v43 }
  0xbe   : > { %708 = vmatprep.mubr.bf16.mxu0 %v2243_v49  ;;  %768 = vmatpush1.bf16.msra.mxu0 %v2248_v50  ;;  %v326_v49 = vld [vmem:[#allocation2 + $0x62] sm:$0xff]  ;;  %v327_v50 = vld [vmem:[#allocation2 + $0x6a] sm:$0xff] }
  0xbf   : > { %769 = vmatprep.subr.bf16.mxu0 %v2254_v51  ;;  %v348_v51 = vpack.c.bf16 %v327_v50, %v326_v49 }
  0xc2   : > { %770 = vmatpush1.bf16.msra.mxu0 %v2252_v54  ;;  %v351_v54 = vpack.c.bf16 %v329_v53, %v328_v52 }
  0xc3   : > { %771 = vmatprep.subr.bf16.mxu0 %v2258_v55  ;;  %v330_v55 = vld [vmem:[#allocation2 + $0x92] sm:$0xff] }
  0xc5   : > { %709 = vmatmul.mubr.bf16.gmra.mrb[12].mxu0 %v343_v56  ;;  %v331_v56 = vld [vmem:[#allocation2 + $0x9a] sm:$0xff] }
  0xc6   : > { %718 = vmatprep.mubr.bf16.mxu0 %v2247_v57  ;;  %772 = vmatpush1.bf16.msra.mxu0 %v2256_v58  ;;  %v354_v57 = vpack.c.bf16 %v331_v56, %v330_v55  ;;  %v332_v58 = vld [vmem:[#allocation2 + $0xaa] sm:$0xff] }
  0xc7   : > { %773 = vmatprep.subr.bf16.mxu0 %v2262_v59  ;;  %v333_v59 = vld [vmem:[#allocation2 + $0xb2] sm:$0xff] }
  0xc8   : > { %v357_v60 = vpack.c.bf16 %v333_v59, %v332_v58 }
  0xca   : > { %774 = vmatpush1.bf16.msra.mxu0 %v2260_v62  ;;  %v2281_v62 = vld [vmem:[#allocation8 + $0x64] ss:$8 sps:$4 sm:$0xff]  }
  0xcb   : > { %1372 = vmatprep.subr.bf16.mxu1 %v2281_v62 }
  0xcd   : > { %719 = vmatmul.mubr.bf16.gmra.mrb[16].mxu0 %v346_v63  ;;  %v2283_v63 = vld [vmem:[#allocation8 + $0x60] ss:$8 sps:$4 sm:$0xff]  }
  0xce   : > { %728 = vmatprep.mubr.bf16.mxu0 %v2251_v0  ;;  %1373 = vmatpush1.bf16.msra.mxu1 %v2283_v63  ;;  %v2284_v0 = vld [vmem:[#allocation8 + $0x74] ss:$8 sps:$4 sm:$0xff]  }
  0xcf   : > { %1374 = vmatprep.subr.bf16.mxu1 %v2284_v0 }
  0xd2   : > { %1375 = vmatpush1.bf16.msra.mxu1 %v2286_v1 }
  0xd3   : > { %1376 = vmatprep.subr.bf16.mxu1 %v2287_v2 }
  0xd5   : > { %729 = vmatmul.mubr.bf16.gmra.mrb[20].mxu0 %v349_v3  ;;  %v2289_v3 = vld [vmem:[#allocation8 + $0x80] ss:$8 sps:$4 sm:$0xff]  }
  0xd6   : > { %738 = vmatprep.mubr.bf16.mxu0 %v2255_v4  ;;  %1377 = vmatpush1.bf16.msra.mxu1 %v2289_v3  ;;  %v2290_v4 = vld [vmem:[#allocation8 + $0x94] ss:$8 sps:$4 sm:$0xff]  }
  0xd7   : > { %1378 = vmatprep.subr.bf16.mxu1 %v2290_v4 }
  0xda   : > { %1379 = vmatpush1.bf16.msra.mxu1 %v2292_v5 }
  0xdb   : > { %1380 = vmatprep.subr.bf16.mxu1 %v2293_v6 }
  0xdd   : > { %739 = vmatmul.mubr.bf16.gmra.mrb[24].mxu0 %v352_v7  ;;  %v2295_v7 = vld [vmem:[#allocation8 + $0xa0] ss:$8 sps:$4 sm:$0xff]  }
  0xde   : > { %748 = vmatprep.mubr.bf16.mxu0 %v2259_v8  ;;  %1381 = vmatpush1.bf16.msra.mxu1 %v2295_v7  ;;  %v2296_v8 = vld [vmem:[#allocation8 + $0xb4] ss:$8 sps:$4 sm:$0xff]  }
  0xdf   : > { %1382 = vmatprep.subr.bf16.mxu1 %v2296_v8 }
  0xe2   : > { %1383 = vmatpush1.bf16.msra.mxu1 %v2298_v9 }
  0xe3   : > { %1384 = vmatprep.subr.bf16.mxu1 %v2299_v10 }
  0xe5   : > { %749 = vmatmul.mubr.bf16.gmra.mrb[28].mxu0 %v355_v11  ;;  %v2301_v11 = vld [vmem:[#allocation8 + $0xc0] ss:$8 sps:$4 sm:$0xff]  }
  0xe6   : > { %791 = vmatprep.mubr.bf16.mxu0 %v2629_v12  ;;  %1385 = vmatpush1.bf16.msra.mxu1 %v2301_v11 }
  0xe7   : > { %1386 = vmatprep.subr.bf16.mxu1 %v2302_v13 }
  0xea   : > { %1387 = vmatpush1.bf16.msra.mxu1 %v2304_v15 }
  0xed   : > { %792 = vmatmul.mubr.bf16.vlgmr.msra.gmra.mrb[0].mxu0 %v336_v18  ;;  %v2305_v18 = vld [vmem:[#allocation8 + $0xe4] ss:$8 sps:$4 sm:$0xff]  }
  0xee   : > { %801 = vmatprep.mubr.bf16.mxu0 %v2629_v12  ;;  %1388 = vmatprep.subr.bf16.mxu1 %v2305_v18 }
  0xef   : > { %1389 = vmatpush1.bf16.msra.mxu1 %v2307_v20 }
  0xf0   : > { %1390 = vmatprep.subr.bf16.mxu1 %v2308_v26 }
  0xf5   : > { %802 = vmatmul.mubr.bf16.gmra.mrb[4].mxu0 %v339_v28  ;;  %v2310_v28 = vld [vmem:[#allocation8 + $0xf0] ss:$8 sps:$4 sm:$0xff]  }
  0xf6   : > { %811 = vmatprep.mubr.bf16.mxu0 %v2629_v12  ;;  %1391 = vmatpush1.bf16.msra.mxu1 %v2310_v28 }
  0xf7   : > { %1473 = vmatprep.subr.bf16.mxu1 %v2313_v34 }
  0xfd   : > { %812 = vmatmul.mubr.bf16.gmra.mrb[8].mxu0 %v342_v40 }
  0xfe   : > { %821 = vmatprep.mubr.bf16.mxu0 %v2629_v12 }
 0x105   : > { %822 = vmatmul.mubr.bf16.gmra.mrb[12].mxu0 %v345_v48 }
 0x106   : > { %831 = vmatprep.mubr.bf16.mxu0 %v2629_v12 }
 0x10d   : > { %832 = vmatmul.mubr.bf16.gmra.mrb[16].mxu0 %v348_v51 }
 0x10e   : > { %841 = vmatprep.mubr.bf16.mxu0 %v2629_v12 }
 0x115   : > { %842 = vmatmul.mubr.bf16.gmra.mrb[20].mxu0 %v351_v54 }
 0x116   : > { %851 = vmatprep.mubr.bf16.mxu0 %v2629_v12 }
 0x11d   : > { %852 = vmatmul.mubr.bf16.gmra.mrb[24].mxu0 %v354_v57 }
 0x11e   : > { %861 = vmatprep.mubr.bf16.mxu0 %v2629_v12 }
 0x125   : > { %862 = vmatmul.mubr.bf16.gmra.mrb[28].mxu0 %v357_v60 }
 0x1c0   : > { %v793_v35 = vpop.f32.mrb[0].mxu0 }
 0x1c1   : > { %v795_v40 = vpop.f32.mrb[1].mxu0 }
 0x1c2   : > { %v1915_v43 = vmul.f32 -1.442695, %v795_v40  ;;  %v797_v45 = vpop.f32.mrb[2].mxu0 }
 0x1c3   : > { %v799_v48 = vpop.f32.mrb[3].mxu0 }
 0x1c4   : > { %2335 = vpow2.f32 %v1915_v43  ;;  %v1916_v49 = vmul.f32 -1.442695, %v799_v48 }
 0x1c6   : > { %2337 = vpow2.f32 %v1916_v49 }
 0x1c8   : > { %v803_v50 = vpop.f32.mrb[4].mxu0 }
 0x1c9   : > { %v805_v51 = vpop.f32.mrb[5].mxu0 }
 0x1ca   : > { %v1917_v52 = vmul.f32 -1.442695, %v805_v51  ;;  %v807_v53 = vpop.f32.mrb[6].mxu0 }
 0x1cb   : > { %v809_v54 = vpop.f32.mrb[7].mxu0 }
 0x1cc   : > { %2339 = vpow2.f32 %v1917_v52  ;;  %v1918_v55 = vmul.f32 -1.442695, %v809_v54 }
 0x1ce   : > { %v2336_v56 = vpop.eup %2335  ;;  %2341 = vpow2.f32 %v1918_v55 }
 0x1cf   : > { %v920_v57 = vadd.f32 1.0, %v2336_v56 }
 0x1d0   : > { %v2338_v58 = vpop.eup %2337  ;;  %v2919_v59 = vpop.f32.mrb[8].mxu0 }
 0x1d1   : > { %2343 = vrcp.f32 %v920_v57  ;;  %v921_v60 = vadd.f32 1.0, %v2338_v58  ;;  %v815_v61 = vpop.f32.mrb[9].mxu0 }
 0x1d2   : > { %v1919_v62 = vmul.f32 -1.442695, %v815_v61  ;;  %v2921_v63 = vpop.f32.mrb[10].mxu0 }
 0x1d3   : > { %2345 = vrcp.f32 %v921_v60  ;;  %v819_v0 = vpop.f32.mrb[11].mxu0 }
 0x1d4   : > { %2347 = vpow2.f32 %v1919_v62  ;;  %v1920_v1 = vmul.f32 -1.442695, %v819_v0  ;;  %v2311_v0 = vld [vmem:[#allocation8 + $0x100] ss:$8 sps:$4 sm:$0xff]  }
 0x1d6   : > { %v2340_v2 = vpop.eup %2339  ;;  %2349 = vpow2.f32 %v1920_v1 }
 0x1d7   : > { %v922_v3 = vadd.f32 1.0, %v2340_v2 }
 0x1d8   : > { %v2342_v4 = vpop.eup %2341  ;;  %v2923_v5 = vpop.f32.mrb[12].mxu0 }
 0x1d9   : > { %2351 = vrcp.f32 %v922_v3  ;;  %v923_v6 = vadd.f32 1.0, %v2342_v4  ;;  %v825_v7 = vpop.f32.mrb[13].mxu0 }
 0x1da   : > { %v1921_v8 = vmul.f32 -1.442695, %v825_v7  ;;  %v2925_v9 = vpop.f32.mrb[14].mxu0 }
 0x1db   : > { %v2344_v10 = vpop.eup %2343  ;;  %2353 = vrcp.f32 %v923_v6  ;;  %v829_v11 = vpop.f32.mrb[15].mxu0  ;;  %v2316_v6 = vld [vmem:[#allocation8 + $0x114] ss:$8 sps:$4 sm:$0xff]  }
 0x1dc   : > { %v968_v13 = vmul.f32 %v2344_v10, %v793_v35  ;;  %2355 = vpow2.f32 %v1921_v8  ;;  %v1922_v15 = vmul.f32 -1.442695, %v829_v11 }
 0x1dd   : > { %v2346_v18 = vpop.eup %2345 }
 0x1de   : > { %v2348_v20 = vpop.eup %2347  ;;  %984 = vst [vmem:[#allocation2 + $0x1] sm:$0xff] %v968_v13  ;;  %v969_v26 = vmul.f32 %v2346_v18, %v797_v45  ;;  %2357 = vpow2.f32 %v1922_v15 }
 0x1df   : > { %v924_v28 = vadd.f32 1.0, %v2348_v20  ;;  %v2319_v20 = vld [vmem:[#allocation8 + $0x124] ss:$8 sps:$4 sm:$0xff]  }
 0x1e0   : > { %v2350_v34 = vpop.eup %2349  ;;  %985 = vst [vmem:[#allocation2 + $0x9] sm:$0xff] %v969_v26  ;;  %v2927_v40 = vpop.f32.mrb[16].mxu0  ;;  %v1049_v43 = vpack.c.bf16 %v969_v26, %v968_v13  ;;  %v2314_v13 = vld [vmem:[#allocation8 + $0x110] ss:$8 sps:$4 sm:$0xff]  }
 0x1e1   : > { %2359 = vrcp.f32 %v924_v28  ;;  %v925_v48 = vadd.f32 1.0, %v2350_v34  ;;  %v835_v49 = vpop.f32.mrb[17].mxu0 }
 0x1e2   : > { %v1923_v51 = vmul.f32 -1.442695, %v835_v49  ;;  %v2929_v52 = vpop.f32.mrb[18].mxu0  ;;  %1392 = vmatprep.mubr.bf16.mxu1 %v1049_v43 }
 0x1e3   : > { %v2352_v35 = vpop.eup %2351  ;;  %2361 = vrcp.f32 %v925_v48  ;;  %v839_v54 = vpop.f32.mrb[19].mxu0 }
 0x1e4   : > { %v970_v55 = vmul.f32 %v2352_v35, %v803_v50  ;;  %2363 = vpow2.f32 %v1923_v51  ;;  %v1924_v45 = vmul.f32 -1.442695, %v839_v54  ;;  %v2317_v51 = vld [vmem:[#allocation8 + $0x120] ss:$8 sps:$4 sm:$0xff]  }
 0x1e5   : > { %v2354_v56 = vpop.eup %2353  ;;  %v1000_v61 = vld [vmem:[#allocation2] sm:$0xff] }
 0x1e6   : > { %v2356_v57 = vpop.eup %2355  ;;  %986 = vst [vmem:[#allocation2 + $0x19] sm:$0xff] %v970_v55  ;;  %v971_v58 = vmul.f32 %v2354_v56, %v807_v53  ;;  %2365 = vpow2.f32 %v1924_v45  ;;  %v2322_v45 = vld [vmem:[#allocation8 + $0x134] ss:$8 sps:$4 sm:$0xff]  }
 0x1e7   : > { %v926_v60 = vadd.f32 1.0, %v2356_v57  ;;  %v1001_v62 = vld [vmem:[#allocation2 + $0x8] sm:$0xff] }
 0x1e8   : > { %v2358_v1 = vpop.eup %2357  ;;  %987 = vst [vmem:[#allocation2 + $0x21] sm:$0xff] %v971_v58  ;;  %v2931_v2 = vpop.f32.mrb[20].mxu0  ;;  %v1048_v3 = vpack.c.bf16 %v1001_v62, %v1000_v61  ;;  %v1052_v4 = vpack.c.bf16 %v971_v58, %v970_v55  ;;  %v2320_v62 = vld [vmem:[#allocation8 + $0x130] ss:$8 sps:$4 sm:$0xff]  }
 0x1e9   : > { %2367 = vrcp.f32 %v926_v60  ;;  %v927_v50 = vadd.f32 1.0, %v2358_v1  ;;  %v845_v7 = vpop.f32.mrb[21].mxu0 }
 0x1ea   : > { %v1925_v8 = vmul.f32 -1.442695, %v845_v7  ;;  %v2933_v10 = vpop.f32.mrb[22].mxu0  ;;  %1393 = vmatmul.mubr.bf16.vlgmr.msra.gmra.mrb[0].mxu1 %v1048_v3  ;;  %v2325_v3 = vld [vmem:[#allocation8 + $0x144] ss:$8 sps:$4 sm:$0xff]  }
 0x1eb   : > { %v2360_v53 = vpop.eup %2359  ;;  %2369 = vrcp.f32 %v927_v50  ;;  %v849_v11 = vpop.f32.mrb[23].mxu0  ;;  %1474 = vmatpush1.bf16.msra.mxu1 %v2311_v0  ;;  %1402 = vmatprep.mubr.bf16.mxu1 %v1052_v4 }
 0x1ec   : > { %v972_v15 = vmul.f32 %v2360_v53, %v2919_v59  ;;  %2371 = vpow2.f32 %v1925_v8  ;;  %v1926_v18 = vmul.f32 -1.442695, %v849_v11  ;;  %1475 = vmatprep.subr.bf16.mxu1 %v2316_v6  ;;  %v2323_v11 = vld [vmem:[#allocation8 + $0x140] ss:$8 sps:$4 sm:$0xff]  }
 0x1ed   : > { %v2362_v26 = vpop.eup %2361  ;;  %v1002_v48 = vld [vmem:[#allocation2 + $0x18] sm:$0xff] }
 0x1ee   : > { %v2364_v28 = vpop.eup %2363  ;;  %988 = vst [vmem:[#allocation2 + $0x31] sm:$0xff] %v972_v15  ;;  %v973_v34 = vmul.f32 %v2362_v26, %v2921_v63  ;;  %2373 = vpow2.f32 %v1926_v18 }
 0x1ef   : > { %v928_v43 = vadd.f32 1.0, %v2364_v28  ;;  %v1003_v49 = vld [vmem:[#allocation2 + $0x20] sm:$0xff]  ;;  %1476 = vmatpush1.bf16.msra.mxu1 %v2314_v13 }
 0x1f0   : > { %v2366_v35 = vpop.eup %2365  ;;  %989 = vst [vmem:[#allocation2 + $0x39] sm:$0xff] %v973_v34  ;;  %v2937_v54 = vpop.f32.mrb[24].mxu0  ;;  %v1051_v59 = vpack.c.bf16 %v1003_v49, %v1002_v48  ;;  %v1055_v55 = vpack.c.bf16 %v973_v34, %v972_v15  ;;  %1477 = vmatprep.subr.bf16.mxu1 %v2319_v20  ;;  %v2328_v20 = vld [vmem:[#allocation8 + $0x154] ss:$8 sps:$4 sm:$0xff]   ;;  %v2326_v49 = vld [vmem:[#allocation8 + $0x150] ss:$8 sps:$4 sm:$0xff]  }
 0x1f1   : > { %2375 = vrcp.f32 %v928_v43  ;;  %v929_v56 = vadd.f32 1.0, %v2366_v35  ;;  %v855_v57 = vpop.f32.mrb[25].mxu0 }
 0x1f2   : > { %v1927_v58 = vmul.f32 -1.442695, %v855_v57  ;;  %v2939_v60 = vpop.f32.mrb[26].mxu0  ;;  %1403 = vmatmul.mubr.bf16.gmra.mrb[4].mxu1 %v1051_v59  ;;  %v2331_v59 = vld [vmem:[#allocation8 + $0x164] ss:$8 sps:$4 sm:$0xff]  }
 0x1f3   : > { %v2368_v63 = vpop.eup %2367  ;;  %2377 = vrcp.f32 %v929_v56  ;;  %v859_v61 = vpop.f32.mrb[27].mxu0  ;;  %1412 = vmatprep.mubr.bf16.mxu1 %v1055_v55  ;;  %1478 = vmatpush1.bf16.msra.mxu1 %v2317_v51 }
 0x1f4   : > { %v974_v0 = vmul.f32 %v2368_v63, %v2923_v5  ;;  %2379 = vpow2.f32 %v1927_v58  ;;  %v1928_v1 = vmul.f32 -1.442695, %v859_v61  ;;  %1479 = vmatprep.subr.bf16.mxu1 %v2322_v45  ;;  %v2329_v61 = vld [vmem:[#allocation8 + $0x160] ss:$8 sps:$4 sm:$0xff]  }
 0x1f5   : > { %v2370_v4 = vpop.eup %2369  ;;  %v1004_v8 = vld [vmem:[#allocation2 + $0x30] sm:$0xff] }
 0x1f6   : > { %v2372_v6 = vpop.eup %2371  ;;  %990 = vst [vmem:[#allocation2 + $0x49] sm:$0xff] %v974_v0  ;;  %v975_v50 = vmul.f32 %v2370_v4, %v2925_v9  ;;  %2381 = vpow2.f32 %v1928_v1 }
 0x1f7   : > { %v930_v7 = vadd.f32 1.0, %v2372_v6  ;;  %v1005_v53 = vld [vmem:[#allocation2 + $0x38] sm:$0xff]  ;;  %1480 = vmatpush1.bf16.msra.mxu1 %v2320_v62 }
 0x1f8   : > { %v2374_v13 = vpop.eup %2373  ;;  %991 = vst [vmem:[#allocation2 + $0x51] sm:$0xff] %v975_v50  ;;  %v2943_v15 = vpop.f32.mrb[28].mxu0  ;;  %v1054_v5 = vpack.c.bf16 %v1005_v53, %v1004_v8  ;;  %v1058_v18 = vpack.c.bf16 %v975_v50, %v974_v0  ;;  %1481 = vmatprep.subr.bf16.mxu1 %v2325_v3 }
 0x1f9   : > { %2383 = vrcp.f32 %v930_v7  ;;  %v931_v26 = vadd.f32 1.0, %v2374_v13  ;;  %v865_v28 = vpop.f32.mrb[29].mxu0 }
 0x1fa   : > { %v1929_v34 = vmul.f32 -1.442695, %v865_v28  ;;  %v2945_v43 = vpop.f32.mrb[30].mxu0  ;;  %1413 = vmatmul.mubr.bf16.gmra.mrb[8].mxu1 %v1054_v5 }
 0x1fb   : > { %v2376_v9 = vpop.eup %2375  ;;  %2385 = vrcp.f32 %v931_v26  ;;  %v869_v48 = vpop.f32.mrb[31].mxu0  ;;  %1422 = vmatprep.mubr.bf16.mxu1 %v1058_v18  ;;  %1482 = vmatpush1.bf16.msra.mxu1 %v2323_v11 }
 0x1fc   : > { %v976_v51 = vmul.f32 %v2376_v9, %v2927_v40  ;;  %2387 = vpow2.f32 %v1929_v34  ;;  %v1930_v35 = vmul.f32 -1.442695, %v869_v48  ;;  %1483 = vmatprep.subr.bf16.mxu1 %v2328_v20  ;;  %v2334_v40 = vld [vmem:[#allocation8 + $0x174] ss:$8 sps:$4 sm:$0xff]  }
 0x1fd   : > { %v2378_v55 = vpop.eup %2377  ;;  %v1006_v58 = vld [vmem:[#allocation2 + $0x48] sm:$0xff] }
 0x1fe   : > { %v2380_v45 = vpop.eup %2379  ;;  %992 = vst [vmem:[#allocation2 + $0x61] sm:$0xff] %v976_v51  ;;  %v977_v56 = vmul.f32 %v2378_v55, %v2929_v52  ;;  %2389 = vpow2.f32 %v1930_v35  ;;  %v2332_v52 = vld [vmem:[#allocation8 + $0x170] ss:$8 sps:$4 sm:$0xff]  }
 0x1ff   : > { %v932_v57 = vadd.f32 1.0, %v2380_v45  ;;  %v1007_v63 = vld [vmem:[#allocation2 + $0x50] sm:$0xff]  ;;  %1484 = vmatpush1.bf16.msra.mxu1 %v2326_v49 }
 0x200   : > { %v2382_v62 = vpop.eup %2381  ;;  %993 = vst [vmem:[#allocation2 + $0x69] sm:$0xff] %v977_v56  ;;  %v1057_v0 = vpack.c.bf16 %v1007_v63, %v1006_v58  ;;  %v1061_v1 = vpack.c.bf16 %v977_v56, %v976_v51  ;;  %1485 = vmatprep.subr.bf16.mxu1 %v2331_v59 }
 0x201   : > { %2391 = vrcp.f32 %v932_v57  ;;  %v933_v3 = vadd.f32 1.0, %v2382_v62  ;;  %v1032_v62 = vld [vmem:[#allocation2 + $0x2] sm:$0xff] }
 0x202   : > { %1423 = vmatmul.mubr.bf16.gmra.mrb[12].mxu1 %v1057_v0  ;;  %v1033_v0 = vld [vmem:[#allocation2 + $0xa] sm:$0xff] }
 0x203   : > { %v2384_v4 = vpop.eup %2383  ;;  %2393 = vrcp.f32 %v933_v3  ;;  %1432 = vmatprep.mubr.bf16.mxu1 %v1061_v1  ;;  %1486 = vmatpush1.bf16.msra.mxu1 %v2329_v61  ;;  %v1035_v1 = vld [vmem:[#allocation2 + $0x22] sm:$0xff]  ;;  %v1036_v3 = vld [vmem:[#allocation2 + $0x32] sm:$0xff] }
 0x204   : > { %v978_v6 = vmul.f32 %v2384_v4, %v2931_v2  ;;  %1487 = vmatprep.subr.bf16.mxu1 %v2334_v40  ;;  %v1037_v4 = vld [vmem:[#allocation2 + $0x3a] sm:$0xff] }
 0x205   : > { %v2386_v50 = vpop.eup %2385  ;;  %v1008_v11 = vld [vmem:[#allocation2 + $0x60] sm:$0xff] }
 0x206   : > { %v2388_v7 = vpop.eup %2387  ;;  %994 = vst [vmem:[#allocation2 + $0x79] sm:$0xff] %v978_v6  ;;  %v979_v8 = vmul.f32 %v2386_v50, %v2933_v10  ;;  %v1039_v50 = vld [vmem:[#allocation2 + $0x52] sm:$0xff] }
 0x207   : > { %v934_v53 = vadd.f32 1.0, %v2388_v7  ;;  %v1009_v13 = vld [vmem:[#allocation2 + $0x68] sm:$0xff]  ;;  %1488 = vmatpush1.bf16.msra.mxu1 %v2332_v52  ;;  %v1056_v52 = vpack.c.bf16 %v1037_v4, %v1036_v3 }
 0x208   : > { %v2390_v5 = vpop.eup %2389  ;;  %995 = vst [vmem:[#allocation2 + $0x81] sm:$0xff] %v979_v8  ;;  %v1060_v18 = vpack.c.bf16 %v1009_v13, %v1008_v11  ;;  %v1064_v20 = vpack.c.bf16 %v979_v8, %v978_v6  ;;  %v1038_v6 = vld [vmem:[#allocation2 + $0x4a] sm:$0xff]  ;;  %v1040_v8 = vld [vmem:[#allocation2 + $0x62] sm:$0xff] }
 0x209   : > { %2395 = vrcp.f32 %v934_v53  ;;  %v935_v26 = vadd.f32 1.0, %v2390_v5  ;;  %v1059_v7 = vpack.c.bf16 %v1039_v50, %v1038_v6  ;;  %v1041_v53 = vld [vmem:[#allocation2 + $0x6a] sm:$0xff] }
 0x20a   : > { %1433 = vmatmul.mubr.bf16.gmra.mrb[16].mxu1 %v1060_v18  ;;  %v1062_v11 = vpack.c.bf16 %v1041_v53, %v1040_v8 }
 0x20b   : > { %v2392_v28 = vpop.eup %2391  ;;  %2397 = vrcp.f32 %v935_v26  ;;  %1442 = vmatprep.mubr.bf16.mxu1 %v1064_v20 }
 0x20c   : > { %v980_v2 = vmul.f32 %v2392_v28, %v2937_v54 }
 0x20d   : > { %v2394_v34 = vpop.eup %2393  ;;  %v1010_v9 = vld [vmem:[#allocation2 + $0x78] sm:$0xff] }
 0x20e   : > { %996 = vst [vmem:[#allocation2 + $0x91] sm:$0xff] %v980_v2  ;;  %v981_v10 = vmul.f32 %v2394_v34, %v2939_v60 }
 0x20f   : > { %v1011_v48 = vld [vmem:[#allocation2 + $0x80] sm:$0xff] }
 0x210   : > { %997 = vst [vmem:[#allocation2 + $0x99] sm:$0xff] %v981_v10  ;;  %v1063_v49 = vpack.c.bf16 %v1011_v48, %v1010_v9  ;;  %v1067_v51 = vpack.c.bf16 %v981_v10, %v980_v2  ;;  %v1042_v13 = vld [vmem:[#allocation2 + $0x7a] sm:$0xff]  ;;  %v1043_v5 = vld [vmem:[#allocation2 + $0x82] sm:$0xff] }
 0x211   : > { %v1065_v18 = vpack.c.bf16 %v1043_v5, %v1042_v13 }
 0x212   : > { %1443 = vmatmul.mubr.bf16.gmra.mrb[20].mxu1 %v1063_v49 }
 0x213   : > { %v2396_v35 = vpop.eup %2395  ;;  %1452 = vmatprep.mubr.bf16.mxu1 %v1067_v51 }
 0x214   : > { %v982_v59 = vmul.f32 %v2396_v35, %v2943_v15  ;;  %v1050_v15 = vpack.c.bf16 %v1033_v0, %v1032_v62 }
 0x215   : > { %v2398_v55 = vpop.eup %2397  ;;  %v1012_v56 = vld [vmem:[#allocation2 + $0x90] sm:$0xff] }
 0x216   : > { %998 = vst [vmem:[#allocation2 + $0xa9] sm:$0xff] %v982_v59  ;;  %v983_v45 = vmul.f32 %v2398_v55, %v2945_v43  ;;  %v1034_v43 = vld [vmem:[#allocation2 + $0x1a] sm:$0xff] }
 0x217   : > { %v1013_v54 = vld [vmem:[#allocation2 + $0x98] sm:$0xff]  ;;  %v1053_v40 = vpack.c.bf16 %v1035_v1, %v1034_v43 }
 0x218   : > { %999 = vst [vmem:[#allocation2 + $0xb1] sm:$0xff] %v983_v45  ;;  %v1066_v57 = vpack.c.bf16 %v1013_v54, %v1012_v56  ;;  %v1070_v58 = vpack.c.bf16 %v983_v45, %v982_v59  ;;  %v1044_v20 = vld [vmem:[#allocation2 + $0x92] sm:$0xff]  ;;  %v1045_v26 = vld [vmem:[#allocation2 + $0x9a] sm:$0xff] }
 0x219   : > { %v1068_v28 = vpack.c.bf16 %v1045_v26, %v1044_v20 }
 0x21a   : > { %1453 = vmatmul.mubr.bf16.gmra.mrb[24].mxu1 %v1066_v57 }
 0x21b   : > { %1462 = vmatprep.mubr.bf16.mxu1 %v1070_v58 }
 0x21d   : > { %v1014_v60 = vld [vmem:[#allocation2 + $0xa8] sm:$0xff] }
 0x21f   : > { %v1015_v63 = vld [vmem:[#allocation2 + $0xb0] sm:$0xff] }
 0x220   : > { %v1069_v61 = vpack.c.bf16 %v1015_v63, %v1014_v60  ;;  %v1046_v2 = vld [vmem:[#allocation2 + $0xaa] sm:$0xff]  ;;  %v1047_v34 = vld [vmem:[#allocation2 + $0xb2] sm:$0xff] }
 0x221   : > { %v1071_v10 = vpack.c.bf16 %v1047_v34, %v1046_v2 }
 0x222   : > { %1463 = vmatmul.mubr.bf16.gmra.mrb[28].mxu1 %v1069_v61 }
 0x223   : > { %1505 = vmatprep.mubr.bf16.mxu1 %v2629_v12 }
 0x22a   : > { %1506 = vmatmul.mubr.bf16.vlgmr.msra.gmra.mrb[0].mxu1 %v1050_v15 }
 0x22b   : > { %1515 = vmatprep.mubr.bf16.mxu1 %v2629_v12 }
 0x232   : > { %1516 = vmatmul.mubr.bf16.gmra.mrb[4].mxu1 %v1053_v40 }
 0x233   : > { %1525 = vmatprep.mubr.bf16.mxu1 %v2629_v12 }
 0x23a   : > { %1526 = vmatmul.mubr.bf16.gmra.mrb[8].mxu1 %v1056_v52 }
 0x23b   : > { %1535 = vmatprep.mubr.bf16.mxu1 %v2629_v12 }
 0x242   : > { %1536 = vmatmul.mubr.bf16.gmra.mrb[12].mxu1 %v1059_v7 }
 0x243   : > { %1545 = vmatprep.mubr.bf16.mxu1 %v2629_v12 }
 0x24a   : > { %1546 = vmatmul.mubr.bf16.gmra.mrb[16].mxu1 %v1062_v11 }
 0x24b   : > { %1555 = vmatprep.mubr.bf16.mxu1 %v2629_v12 }
 0x252   : > { %1556 = vmatmul.mubr.bf16.gmra.mrb[20].mxu1 %v1065_v18 }
 0x253   : > { %1565 = vmatprep.mubr.bf16.mxu1 %v2629_v12 }
 0x25a   : > { %1566 = vmatmul.mubr.bf16.gmra.mrb[24].mxu1 %v1068_v28 }
 0x25b   : > { %1575 = vmatprep.mubr.bf16.mxu1 %v2629_v12 }
 0x262   : > { %1576 = vmatmul.mubr.bf16.gmra.mrb[28].mxu1 %v1071_v10 }
 0x2fd   : > { %v1507_v9 = vpop.f32.mrb[0].mxu1 }
 0x2fe   : > { %v1509_v48 = vpop.f32.mrb[1].mxu1 }
 0x2ff   : > { %v1979_v49 = vmul.f32 -1.442695, %v1509_v48  ;;  %v1511_v51 = vpop.f32.mrb[2].mxu1 }
 0x300   : > { %v1513_v35 = vpop.f32.mrb[3].mxu1 }
 0x301   : > { %2399 = vpow2.f32 %v1979_v49  ;;  %v1980_v59 = vmul.f32 -1.442695, %v1513_v35 }
 0x303   : > { %2401 = vpow2.f32 %v1980_v59 }
 0x305   : > { %v1517_v55 = vpop.f32.mrb[4].mxu1 }
 0x306   : > { %v1519_v45 = vpop.f32.mrb[5].mxu1 }
 0x307   : > { %v1981_v56 = vmul.f32 -1.442695, %v1519_v45  ;;  %v2963_v54 = vpop.f32.mrb[6].mxu1 }
 0x308   : > { %v1523_v57 = vpop.f32.mrb[7].mxu1 }
 0x309   : > { %2403 = vpow2.f32 %v1981_v56  ;;  %v1982_v12 = vmul.f32 -1.442695, %v1523_v57 }
 0x30b   : > { %v2400_v58 = vpop.eup %2399  ;;  %2405 = vpow2.f32 %v1982_v12 }
 0x30c   : > { %v1634_v60 = vadd.f32 1.0, %v2400_v58 }
 0x30d   : > { %v2402_v63 = vpop.eup %2401  ;;  %v2965_v61 = vpop.f32.mrb[8].mxu1 }
 0x30e   : > { %2407 = vrcp.f32 %v1634_v60  ;;  %v1635_v62 = vadd.f32 1.0, %v2402_v63  ;;  %v1529_v0 = vpop.f32.mrb[9].mxu1 }
 0x30f   : > { %v1983_v15 = vmul.f32 -1.442695, %v1529_v0  ;;  %v2967_v43 = vpop.f32.mrb[10].mxu1 }
 0x310   : > { %2409 = vrcp.f32 %v1635_v62  ;;  %v1533_v1 = vpop.f32.mrb[11].mxu1 }
 0x311   : > { %2411 = vpow2.f32 %v1983_v15  ;;  %v1984_v40 = vmul.f32 -1.442695, %v1533_v1 }
 0x313   : > { %v2404_v3 = vpop.eup %2403  ;;  %2413 = vpow2.f32 %v1984_v40 }
 0x314   : > { %v1636_v4 = vadd.f32 1.0, %v2404_v3 }
 0x315   : > { %v2406_v52 = vpop.eup %2405  ;;  %v2969_v6 = vpop.f32.mrb[12].mxu1 }
 0x316   : > { %2415 = vrcp.f32 %v1636_v4  ;;  %v1637_v50 = vadd.f32 1.0, %v2406_v52  ;;  %v1539_v7 = vpop.f32.mrb[13].mxu1 }
 0x317   : > { %v1985_v8 = vmul.f32 -1.442695, %v1539_v7  ;;  %v2971_v53 = vpop.f32.mrb[14].mxu1 }
 0x318   : > { %v2408_v11 = vpop.eup %2407  ;;  %2417 = vrcp.f32 %v1637_v50  ;;  %v1543_v13 = vpop.f32.mrb[15].mxu1 }
 0x319   : > { %v1682_v5 = vmul.f32 %v2408_v11, %v1507_v9  ;;  %2419 = vpow2.f32 %v1985_v8  ;;  %v1986_v18 = vmul.f32 -1.442695, %v1543_v13 }
 0x31a   : > { %v2410_v20 = vpop.eup %2409 }
 0x31b   : > { %v2412_v26 = vpop.eup %2411  ;;  %v1698_v28 = vadd.f32 %v2007_v16, %v1682_v5  ;;  %v1683_v2 = vmul.f32 %v2410_v20, %v1511_v51  ;;  %2421 = vpow2.f32 %v1986_v18 }
 0x31c   : > { %v1638_v34 = vadd.f32 1.0, %v2412_v26 }
 0x31d   : > { %v2414_v10 = vpop.eup %2413  ;;  %v1714_v48 = vmax.f32 %v1698_v28, 0.0  ;;  %v1699_v49 = vadd.f32 %v2008_v17, %v1683_v2  ;;  %v2978_v35 = vpop.f32.mrb[16].mxu1 }
 0x31e   : > { %2423 = vrcp.f32 %v1638_v34  ;;  %v1639_v59 = vadd.f32 1.0, %v2414_v10  ;;  %v1549_v9 = vpop.f32.mrb[17].mxu1 }
 0x31f   : > { %1730 = vst [vmem:[%s2980_s20] sm:$0xff] %v1714_v48  ;;  %v1715_v45 = vmax.f32 %v1699_v49, 0.0  ;;  %v1987_v16 = vmul.f32 -1.442695, %v1549_v9  ;;  %v2983_v51 = vpop.f32.mrb[18].mxu1 }
 0x320   : > { %v2416_v56 = vpop.eup %2415  ;;  %2425 = vrcp.f32 %v1639_v59  ;;  %v1553_v57 = vpop.f32.mrb[19].mxu1 }
 0x321   : > { %1731 = vst [vmem:[%s2980_s20 + $0x8] sm:$0xff] %v1715_v45  ;;  %v1684_v14 = vmul.f32 %v2416_v56, %v1517_v55  ;;  %2427 = vpow2.f32 %v1987_v16  ;;  %v1988_v17 = vmul.f32 -1.442695, %v1553_v57 }
 0x322   : > { %v2418_v12 = vpop.eup %2417 }
 0x323   : > { %v2420_v58 = vpop.eup %2419  ;;  %v1700_v60 = vadd.f32 %v2011_v21, %v1684_v14  ;;  %v1685_v63 = vmul.f32 %v2418_v12, %v2963_v54  ;;  %2429 = vpow2.f32 %v1988_v17 }
 0x324   : > { %v1640_v62 = vadd.f32 1.0, %v2420_v58 }
 0x325   : > { %v2422_v0 = vpop.eup %2421  ;;  %v1716_v15 = vmax.f32 %v1700_v60, 0.0  ;;  %v1701_v1 = vadd.f32 %v2012_v22, %v1685_v63  ;;  %v2991_v40 = vpop.f32.mrb[20].mxu1 }
 0x326   : > { %2431 = vrcp.f32 %v1640_v62  ;;  %v1641_v55 = vadd.f32 1.0, %v2422_v0  ;;  %v1559_v3 = vpop.f32.mrb[21].mxu1 }
 0x327   : > { %1732 = vst [vmem:[%s2980_s20 + $0x10] sm:$0xff] %v1716_v15  ;;  %v1717_v4 = vmax.f32 %v1701_v1, 0.0  ;;  %v1989_v52 = vmul.f32 -1.442695, %v1559_v3  ;;  %v2994_v50 = vpop.f32.mrb[22].mxu1 }
 0x328   : > { %v2424_v21 = vpop.eup %2423  ;;  %2433 = vrcp.f32 %v1641_v55  ;;  %v1563_v54 = vpop.f32.mrb[23].mxu1 }
 0x329   : > { %1733 = vst [vmem:[%s2980_s20 + $0x18] sm:$0xff] %v1717_v4  ;;  %v1686_v7 = vmul.f32 %v2424_v21, %v2965_v61  ;;  %2435 = vpow2.f32 %v1989_v52  ;;  %v1990_v19 = vmul.f32 -1.442695, %v1563_v54 }
 0x32a   : > { %v2426_v22 = vpop.eup %2425 }
 0x32b   : > { %v2428_v8 = vpop.eup %2427  ;;  %v1702_v11 = vadd.f32 %v2015_v24, %v1686_v7  ;;  %v1687_v13 = vmul.f32 %v2426_v22, %v2967_v43  ;;  %2437 = vpow2.f32 %v1990_v19 }
 0x32c   : > { %v1642_v5 = vadd.f32 1.0, %v2428_v8 }
 0x32d   : > { %v2430_v18 = vpop.eup %2429  ;;  %v1718_v20 = vmax.f32 %v1702_v11, 0.0  ;;  %v1703_v26 = vadd.f32 %v2016_v25, %v1687_v13  ;;  %v3003_v28 = vpop.f32.mrb[24].mxu1 }
 0x32e   : > { %2439 = vrcp.f32 %v1642_v5  ;;  %v1643_v61 = vadd.f32 1.0, %v2430_v18  ;;  %v1569_v2 = vpop.f32.mrb[25].mxu1 }
 0x32f   : > { %1734 = vst [vmem:[%s2980_s20 + $0x20] sm:$0xff] %v1718_v20  ;;  %v1719_v34 = vmax.f32 %v1703_v26, 0.0  ;;  %v1991_v10 = vmul.f32 -1.442695, %v1569_v2  ;;  %v3006_v48 = vpop.f32.mrb[26].mxu1 }
 0x330   : > { %v2432_v24 = vpop.eup %2431  ;;  %2441 = vrcp.f32 %v1643_v61  ;;  %v1573_v43 = vpop.f32.mrb[27].mxu1 }
 0x331   : > { %1735 = vst [vmem:[%s2980_s20 + $0x28] sm:$0xff] %v1719_v34  ;;  %v1688_v49 = vmul.f32 %v2432_v24, %v2969_v6  ;;  %2443 = vpow2.f32 %v1991_v10  ;;  %v1992_v23 = vmul.f32 -1.442695, %v1573_v43 }
 0x332   : > { %v2434_v25 = vpop.eup %2433 }
 0x333   : > { %v2436_v59 = vpop.eup %2435  ;;  %v1704_v9 = vadd.f32 %v2019_v29, %v1688_v49  ;;  %v1689_v45 = vmul.f32 %v2434_v25, %v2971_v53  ;;  %2445 = vpow2.f32 %v1992_v23 }
 0x334   : > { %v1644_v16 = vadd.f32 1.0, %v2436_v59 }
 0x335   : > { %v2438_v56 = vpop.eup %2437  ;;  %v1720_v57 = vmax.f32 %v1704_v9, 0.0  ;;  %v1705_v14 = vadd.f32 %v2020_v30, %v1689_v45  ;;  %v1577_v17 = vpop.f32.mrb[28].mxu1 }
 0x336   : > { %2447 = vrcp.f32 %v1644_v16  ;;  %v1645_v6 = vadd.f32 1.0, %v2438_v56  ;;  %v1579_v12 = vpop.f32.mrb[29].mxu1 }
 0x337   : > { %1736 = vst [vmem:[%s2980_s20 + $0x30] sm:$0xff] %v1720_v57  ;;  %v1721_v58 = vmax.f32 %v1705_v14, 0.0  ;;  %v1993_v60 = vmul.f32 -1.442695, %v1579_v12  ;;  %v1581_v63 = vpop.f32.mrb[30].mxu1 }
 0x338   : > { %v2440_v62 = vpop.eup %2439  ;;  %2449 = vrcp.f32 %v1645_v6  ;;  %v1583_v29 = vpop.f32.mrb[31].mxu1 }
 0x339   : > { %1737 = vst [vmem:[%s2980_s20 + $0x38] sm:$0xff] %v1721_v58  ;;  %v1690_v53 = vmul.f32 %v2440_v62, %v2978_v35  ;;  %2451 = vpow2.f32 %v1993_v60  ;;  %v1994_v0 = vmul.f32 -1.442695, %v1583_v29 }
 0x33a   : > { %v2442_v27 = vpop.eup %2441 }
 0x33b   : > { %v2444_v30 = vpop.eup %2443  ;;  %v1706_v15 = vadd.f32 %v2023_v32, %v1690_v53  ;;  %v1691_v1 = vmul.f32 %v2442_v27, %v2983_v51  ;;  %2453 = vpow2.f32 %v1994_v0 }
 0x33c   : > { %v1646_v55 = vadd.f32 1.0, %v2444_v30 }
 0x33d   : > { %v2446_v3 = vpop.eup %2445  ;;  %v1722_v4 = vmax.f32 %v1706_v15, 0.0  ;;  %v1707_v52 = vadd.f32 %v2024_v33, %v1691_v1 }
 0x33e   : > { %2455 = vrcp.f32 %v1646_v55  ;;  %v1647_v21 = vadd.f32 1.0, %v2446_v3 }
 0x33f   : > { %1738 = vst [vmem:[%s2980_s20 + $0x40] sm:$0xff] %v1722_v4  ;;  %v1723_v35 = vmax.f32 %v1707_v52, 0.0 }
 0x340   : > { %v2448_v54 = vpop.eup %2447  ;;  %2457 = vrcp.f32 %v1647_v21 }
 0x341   : > { %1739 = vst [vmem:[%s2980_s20 + $0x48] sm:$0xff] %v1723_v35  ;;  %v1692_v32 = vmul.f32 %v2448_v54, %v2991_v40 }
 0x342   : > { %v2450_v7 = vpop.eup %2449 }
 0x343   : > { %v2452_v51 = vpop.eup %2451  ;;  %v1708_v19 = vadd.f32 %v2027_v37, %v1692_v32  ;;  %v1693_v22 = vmul.f32 %v2450_v7, %v2994_v50 }
 0x344   : > { %v1648_v31 = vadd.f32 1.0, %v2452_v51 }
 0x345   : > { %v2454_v33 = vpop.eup %2453  ;;  %v1724_v8 = vmax.f32 %v1708_v19, 0.0  ;;  %v1709_v11 = vadd.f32 %v2028_v38, %v1693_v22 }
 0x346   : > { %2459 = vrcp.f32 %v1648_v31  ;;  %v1649_v13 = vadd.f32 1.0, %v2454_v33 }
 0x347   : > { %1740 = vst [vmem:[%s2980_s20 + $0x50] sm:$0xff] %v1724_v8  ;;  %v1725_v5 = vmax.f32 %v1709_v11, 0.0 }
 0x348   : > { %v2456_v40 = vpop.eup %2455  ;;  %2461 = vrcp.f32 %v1649_v13 }
 0x349   : > { %1741 = vst [vmem:[%s2980_s20 + $0x58] sm:$0xff] %v1725_v5  ;;  %v1694_v37 = vmul.f32 %v2456_v40, %v3003_v28 }
 0x34a   : > { %v2458_v50 = vpop.eup %2457 }
 0x34b   : > { %v1710_v18 = vadd.f32 %v2031_v41, %v1694_v37  ;;  %v1695_v20 = vmul.f32 %v2458_v50, %v3006_v48 }
 0x34d   : > { %v1726_v36 = vmax.f32 %v1710_v18, 0.0  ;;  %v1711_v38 = vadd.f32 %v2032_v42, %v1695_v20 }
 0x34f   : > { %1742 = vst [vmem:[%s2980_s20 + $0x60] sm:$0xff] %v1726_v36  ;;  %v1727_v26 = vmax.f32 %v1711_v38, 0.0 }
 0x350   : > { %v2460_v61 = vpop.eup %2459 }
 0x351   : > { %1743 = vst [vmem:[%s2980_s20 + $0x68] sm:$0xff] %v1727_v26  ;;  %v1696_v2 = vmul.f32 %v2460_v61, %v1577_v17 }
 0x352   : > { %v2462_v28 = vpop.eup %2461 }
 0x353   : > { %v1712_v34 = vadd.f32 %v2035_v46, %v1696_v2  ;;  %v1697_v41 = vmul.f32 %v2462_v28, %v1581_v63 }
 0x355   : > { %v1728_v10 = vmax.f32 %v1712_v34, 0.0  ;;  %v1713_v39 = vadd.f32 %v2036_v47, %v1697_v41 }
 0x357   : > { %1744 = vst [vmem:[%s2980_s20 + $0x70] sm:$0xff] %v1728_v10  ;;  %v1729_v42 = vmax.f32 %v1713_v39, 0.0 }
 0x359   : > { %1745 = vst [vmem:[%s2980_s20 + $0x78] sm:$0xff] %v1729_v42 }
 0x35a   : > { %2562 = shalt.err (!%p2559_p7)
}
 0x35b   : > { %s2563_s7 = scalar_lea.hbm %s3050_s23, 2048  ;;  %s2567_s22 = scalar_lea.hbm %s3100_s3, 8192 }
 0x35c   : > { %p2564_p9 = scmp.ne.s32.totalorder %s3050_s23, %s2563_s7  ;;  %p2568_p5 = scmp.lt.u32.totalorder %s3050_s23, %s3100_s3 }
 0x35d   : > { %p2569_p10 = scmp.lt.u32.totalorder %s2567_s22, %s2563_s7  ;;  %p2571_p1 = scmp.lt.u32.totalorder %s2563_s7, %s3050_s23 }
 0x35e   : > { %p2565_p12 = pnand %p2564_p9, %p2765_p4 }
 0x35f   : > { %p2570_p11 = por %p2569_p10, %p2568_p5 }
 0x360   : > { %p2566_p0 = pneg %p2565_p12 }
 0x361   : > { %p2572_p2 = por %p2571_p1, %p2570_p11 }
 0x363   : > { %p2573_p6 = pnand %p2572_p2, %p2566_p0 }
 0x365   : > { %2576 = shalt.err (!%p2573_p6)
}
 0x366   : > { %s2631_s18 = smov 128   ;;  %s2632_s20 = smov 8  }
 0x367   : > { %2118 = dma.vmem_to_hbm [thread:$0]  (%p2765_p4), %s3052_s24, 2048, %s3050_s23, %s1747_s5, %s2631_s18, %s2631_s18, %s2632_s20  }
 0x368 PF: > { %p2140_p8 = scmp.ge.s32.totalorder %s2619_s15, 2  ;;  %s1776_s17 = sand.u32 1, %s2607_s12  }
 0x369   : > { %p3115_p13 = scmp.ne.s32.totalorder %s3105_s19, 0  ;;  %s1777_s26 = scalar_lea.sflag [#allocation5], %s1776_s17 }
 0x36b   : > { %p2132_p3 = pnand %p2140_p8, %p3115_p13 }
 0x36d   : > { %2602 = dma.done.wait (!%p2132_p3), %s1777_s26, 2048  }
 0x36e   : > { %2604 = vsyncadd (!%p2132_p3), %s1777_s26, 4294965248  ;;  %p17_p7 = scmp.ge.s32.totalorder %s2755_s4, 6   ;;  %s3116_s12 = smov %s2611_s13 }
 0x36f   : > { %s3117_s13 = smov %s2615_s14  ;;  %s3118_s14 = smov %s2771_s9 }
 0x370   : > { %s3119_s15 = smov %s2755_s4  ;;  %19 = sbr.rel (!%p17_p7) target bundleno = 6 (0x6), region = 85 }
 0x377   :  { %1782 = vsyncpa [#allocation4], 1 }
 0x378   :  { %1784 = vsyncpa [#allocation4 + $0x1], 1 }
 0x379   :  { %1785 = vsyncpa [#allocation7], 1 }
 0x37a   :  { %1786 = vsyncpa [#allocation5], 1 }
 0x37b   :  { %1788 = vsyncpa [#allocation5 + $0x1], 1 }

</bundles_post_ra>
